<compile_context>
chip_gen: v7x
topology: tpu7x:2x2x1
jax: 0.10.0
libtpu: 0.0.40
codegen_flags: <defaults>
</compile_context>

<pallas_src>
import functools

import jax
import jax.numpy as jnp
from jax import lax
from jax.experimental import pallas as pl
from jax.experimental.pallas import tpu as pltpu


def make_gru_kernel(unroll):
    def gru_kernel(xp_ref, len_ref, whh_ref, bhn_ref, wl_ref, bl_ref, out_ref, h_ref):
        """One grid step runs Tc timesteps of the GRU recurrence on the persistent h scratch."""
        c = pl.program_id(0)
        Tc = xp_ref.shape[0]
        Hp = h_ref.shape[1]

        @pl.when(c == 0)
        def _():
            h_ref[...] = jnp.zeros_like(h_ref)

        whh = whh_ref[...]          # (Hp, 3Hp) bf16, fused gates in (r, z, n) order
        b_hn = bhn_ref[...]         # (1, Hp)  f32, hidden-side n-gate bias (stays inside r*(.))
        lens = len_ref[...]         # (Bp, 1)  f32 sequence lengths
        t_base = c * Tc             # global timestep offset of this chunk

        def step(s, h):
            xp = xp_ref[s].astype(jnp.float32)     # (Bp, 3Hp) bf16 slab -> f32 gate math
            # Single fused recurrent matmul on the serial critical path (bf16 in, f32 acc).
            hh = jnp.dot(h.astype(jnp.bfloat16), whh,
                         preferred_element_type=jnp.float32)         # (Bp, 3Hp) f32
            r = jax.nn.sigmoid(xp[:, 0:Hp] + hh[:, 0:Hp])
            z = jax.nn.sigmoid(xp[:, Hp:2 * Hp] + hh[:, Hp:2 * Hp])
            n = jnp.tanh(xp[:, 2 * Hp:3 * Hp] + r * (hh[:, 2 * Hp:3 * Hp] + b_hn))
            h_cand = n + z * (h - n)               # == (1-z)*n + z*h, one fewer (Bp,Hp) op
            # pack_padded_sequence semantics: freeze h once t >= length[b].
            m = (lens > (t_base + s).astype(jnp.float32)).astype(jnp.float32)   # (Bp, 1)
            return h + m * (h_cand - h)

        h_ref[...] = lax.fori_loop(0, Tc, step, h_ref[...], unroll=unroll)

        @pl.when(c == pl.num_programs(0) - 1)
        def _():
            # Linear(H -> 1) as a lane-dense VPU multiply + cross-lane reduce (no N=1 MXU op).
            logits = jnp.sum(h_ref[...] * wl_ref[...], axis=-1, keepdims=True) + bl_ref[0, 0]
            out_ref[...] = jax.nn.sigmoid(logits)

    return gru_kernel


def _round_up(x, m):
    return (x + m - 1) // m * m


def _pad_axis(a, axis, target):
    pad = target - a.shape[axis]
    if pad == 0:
        return a
    cfg = [(0, 0)] * a.ndim
    cfg[axis] = (0, pad)
    return jnp.pad(a, cfg)


@functools.partial(jax.jit, static_argnames=("chunk", "unroll"))
def rnn_forward(x_ids, lengths, params, *, chunk=None, unroll=8):
    """x_ids: (B, T) int32 token ids, lengths: (B,) int32 (sorted descending)."""
    emb, w_ih, w_hh, b_ih, b_hh, w_lin, b_lin = (
        params["emb"], params["w_ih"], params["w_hh"], params["b_ih"],
        params["b_hh"], params["w_lin"], params["b_lin"])
    B, T = x_ids.shape
    E = emb.shape[1]
    H = w_hh.shape[2]
    Hp = _round_up(H, 128)            # lane-align each gate slice (zero-padded weights)
    Bp = _round_up(max(B, 8), 8)      # fill sublanes; extra batch rows are ~free on the MXU

    # ---- glue: embedding gather, time-major layout ------------------------------------
    x_emb = jnp.transpose(emb[x_ids], (1, 0, 2)).astype(jnp.float32)          # (T, B, E)

    # ---- glue: hoisted, fused input projection as one big bf16 matmul ------------------
    w_ih_f = jnp.concatenate([_pad_axis(w_ih[g], 1, Hp) for g in range(3)],
                             axis=1).astype(jnp.bfloat16)                     # (E, 3Hp)
    # r/z biases pre-summed (input+hidden); n-gate keeps only its input bias here.
    b_in_f = jnp.concatenate([_pad_axis(b_ih[0] + b_hh[0], 1, Hp),
                              _pad_axis(b_ih[1] + b_hh[1], 1, Hp),
                              _pad_axis(b_ih[2], 1, Hp)], axis=1)             # (1, 3Hp) f32
    x_proj = (jnp.dot(x_emb.reshape(T * B, E).astype(jnp.bfloat16), w_ih_f,
                      preferred_element_type=jnp.float32).reshape(T, B, 3 * Hp)
              + b_in_f)                                                        # (T, B, 3Hp) f32

    # ---- per-chip-generation Tc / VMEM budget derivation --------------------------------
    try:
        vmem_cap = int(pltpu.get_tpu_info().vmem_capacity_bytes)
    except Exception:                                    # pragma: no cover - conservative default
        vmem_cap = 64 * 1024 * 1024                      # v7x per-TensorCore capacity
    vmem_budget = min(int(vmem_cap * 3 // 4), 112 * 1024 * 1024)   # leave compiler headroom
    bytes_per_step = Bp * 3 * Hp * 2                     # one bf16 pre-activation row
    fixed_bytes = (2 * (Hp * 3 * Hp * 2)                 # W_hh bf16, double-buffered
                   + 2 * 2 * (8 * Hp * 4)                # b_hn / w_lin blocks (sublane-padded)
                   + 2 * (Bp * 128 * 4) + (Bp * 128 * 4) # lengths column + output block
                   + Bp * Hp * 4                         # h scratch
                   + (4 << 20))                          # internal scratch headroom
    tc_cap = max(1, (vmem_budget - fixed_bytes) // (2 * bytes_per_step))
    if chunk is None:
        chunk = 128 if vmem_cap > (64 << 20) else 32     # larger chunks on 128 MiB-VMEM chips
    Tc = int(max(1, min(chunk, tc_cap, T)))
    n_chunks = pl.cdiv(T, Tc)
    T_pad = n_chunks * Tc

    # ---- pad the streaming slab / lengths; slab stored in bf16 (halves DMA + VMEM) -----
    x_proj = _pad_axis(_pad_axis(x_proj, 0, T_pad), 1, Bp).astype(jnp.bfloat16)  # (T_pad,Bp,3Hp)
    len_col = _pad_axis(lengths.astype(jnp.float32), 0, Bp).reshape(Bp, 1)       # (Bp, 1)

    # ---- kernel-side constant operands --------------------------------------------------
    w_hh_f = jnp.concatenate(
        [jnp.pad(w_hh[g], ((0, Hp - H), (0, Hp - H))) for g in range(3)],
        axis=1).astype(jnp.bfloat16)                                           # (Hp, 3Hp)
    b_hh_n = _pad_axis(b_hh[2].astype(jnp.float32), 1, Hp)                     # (1, Hp)
    w_lin_row = _pad_axis(w_lin.reshape(1, H).astype(jnp.float32), 1, Hp)      # (1, Hp)
    b_lin_s = b_lin.reshape(1, 1).astype(jnp.float32)                          # (1, 1) -> SMEM

    out = pl.pallas_call(
        make_gru_kernel(unroll),
        out_shape=jax.ShapeDtypeStruct((Bp, 1), jnp.float32),
        grid_spec=pltpu.PrefetchScalarGridSpec(
            num_scalar_prefetch=0,
            grid=(n_chunks,),
            in_specs=[
                pl.BlockSpec((Tc, Bp, 3 * Hp), lambda c: (c, 0, 0)),   # bf16 pre-activation slab
                pl.BlockSpec((Bp, 1), lambda c: (0, 0)),               # lengths column
                pl.BlockSpec((Hp, 3 * Hp), lambda c: (0, 0)),          # fused W_hh (DMA'd once)
                pl.BlockSpec((1, Hp), lambda c: (0, 0)),               # b_hh (n gate)
                pl.BlockSpec((1, Hp), lambda c: (0, 0)),               # Linear weight row
                pl.BlockSpec(memory_space=pltpu.MemorySpace.SMEM),     # Linear bias scalar
            ],
            out_specs=pl.BlockSpec((Bp, 1), lambda c: (0, 0)),
            scratch_shapes=[pltpu.VMEM((Bp, Hp), jnp.float32)],
        ),
        compiler_params=pltpu.CompilerParams(
            dimension_semantics=("arbitrary",),          # time chunks are sequential
            vmem_limit_bytes=int(vmem_budget),
        ),
    )(x_proj, len_col, w_hh_f, b_hh_n, w_lin_row, b_lin_s)
    return out[:B]


def rnn_reference(x_ids, lengths, params):
    """Pure-JAX f32 reference (same math as torch.nn.GRU + pack_padded_sequence)."""
    emb, w_ih, w_hh, b_ih, b_hh, w_lin, b_lin = (
        params["emb"], params["w_ih"], params["w_hh"], params["b_ih"],
        params["b_hh"], params["w_lin"], params["b_lin"])
    B, T = x_ids.shape
    x_emb = jnp.transpose(emb[x_ids], (1, 0, 2)).astype(jnp.float32)  # (T, B, E)

    def step(h, inp):
        x_t, t = inp
        i_r = x_t @ w_ih[0] + b_ih[0]
        i_z = x_t @ w_ih[1] + b_ih[1]
        i_n = x_t @ w_ih[2] + b_ih[2]
        h_r = h @ w_hh[0] + b_hh[0]
        h_z = h @ w_hh[1] + b_hh[1]
        h_n = h @ w_hh[2] + b_hh[2]
        r = jax.nn.sigmoid(i_r + h_r)
        z = jax.nn.sigmoid(i_z + h_z)
        n = jnp.tanh(i_n + r * h_n)
        h_cand = (1.0 - z) * n + z * h
        mask = (t < lengths)[:, None]
        return jnp.where(mask, h_cand, h), None

    h0 = jnp.zeros((B, w_hh.shape[2]), jnp.float32)
    h_n_final, _ = lax.scan(step, h0, (x_emb, jnp.arange(T)))
    return jax.nn.sigmoid(h_n_final @ w_lin + b_lin)


def make_params(key, vocab_size, embed_dim, hidden_dim):
    ks = jax.random.split(key, 7)
    s = 1.0 / jnp.sqrt(hidden_dim)
    return {
        "emb":   jax.random.normal(ks[0], (vocab_size, embed_dim), jnp.float32) * 0.1,
        "w_ih":  jax.random.uniform(ks[1], (3, embed_dim, hidden_dim), jnp.float32, -s, s),
        "w_hh":  jax.random.uniform(ks[2], (3, hidden_dim, hidden_dim), jnp.float32, -s, s),
        "b_ih":  jax.random.uniform(ks[3], (3, 1, hidden_dim), jnp.float32, -s, s),
        "b_hh":  jax.random.uniform(ks[4], (3, 1, hidden_dim), jnp.float32, -s, s),
        # NOTE: the PyTorch module applies nn.Linear(embedding_dim, 1) to h_n, which only
        # typechecks when hidden_dim == embedding_dim; we honor that constraint.
        "w_lin": jax.random.uniform(ks[5], (hidden_dim, 1), jnp.float32, -s, s),
        "b_lin": jax.random.uniform(ks[6], (1, 1), jnp.float32, -s, s),
    }


if __name__ == "__main__":
    key = jax.random.PRNGKey(0)
    B, T = 2, 8
    vocab_size = 50
    embed_dim = 32
    hidden_dim = 32   # == embed_dim, required by the original module's Linear

    k_tok, k_par = jax.random.split(key)
    x_ids = jax.random.randint(k_tok, (B, T), 0, vocab_size, dtype=jnp.int32)
    lengths = jnp.array([8, 5], dtype=jnp.int32)   # sorted descending (enforce_sorted=True)
    params = make_params(k_par, vocab_size, embed_dim, hidden_dim)

    out = rnn_forward(x_ids, lengths, params)
    jax.block_until_ready(out)

    ref = rnn_reference(x_ids, lengths, params)
    assert out.shape == (B, 1)
    # Tolerance accounts for bf16 weights / bf16 pre-activation slab vs. the all-f32 reference.
    assert jnp.allclose(out, ref, atol=2e-2, rtol=2e-2), (out, ref)

    print("KERNEL_OK")
</pallas_src>

<mosaic_0001>
module attributes {stable_mosaic.version = 11 : i64} {
  func.func @gru_kernel(%arg0: i32, %arg1: memref<8x8x384xbf16, #tpu.memory_space<vmem>>, %arg2: memref<8x1xf32, #tpu.memory_space<vmem>>, %arg3: memref<128x384xbf16, #tpu.memory_space<vmem>>, %arg4: memref<1x128xf32, #tpu.memory_space<vmem>>, %arg5: memref<1x128xf32, #tpu.memory_space<vmem>>, %arg6: memref<1x1xf32, #tpu.memory_space<smem>>, %arg7: memref<8x1xf32, #tpu.memory_space<vmem>>, %arg8: memref<8x128xf32, #tpu.memory_space<vmem>>) attributes {dimension_semantics = [#tpu.dimension_semantics<arbitrary>], iteration_bounds = array<i64: 1>, scalar_prefetch = 0 : i64, scratch_operands = 1 : i64, tpu.core_type = #tpu.core_type<tc>, window_params = [{transform_indices = @transform_0, window_bounds = array<i64: 8, 8, 384>}, {pipeline_mode = #tpu.pipeline_mode<synchronous>, transform_indices = @transform_1, window_bounds = array<i64: 8, 1>}, {pipeline_mode = #tpu.pipeline_mode<synchronous>, transform_indices = @transform_2, window_bounds = array<i64: 128, 384>}, {pipeline_mode = #tpu.pipeline_mode<synchronous>, transform_indices = @transform_3, window_bounds = array<i64: 1, 128>}, {pipeline_mode = #tpu.pipeline_mode<synchronous>, transform_indices = @transform_4, window_bounds = array<i64: 1, 128>}, {transform_indices = @transform_5, window_bounds = array<i64: 1, 1>}, {pipeline_mode = #tpu.pipeline_mode<synchronous>, transform_indices = @transform_6, window_bounds = array<i64: 8, 1>}]} {
    %c0_i32 = arith.constant 0 : i32
    %0 = arith.cmpi eq, %arg0, %c0_i32 : i32
    %1 = arith.extui %0 : i1 to i32
    %c0_i32_0 = arith.constant 0 : i32
    %2 = arith.cmpi ne, %1, %c0_i32_0 : i32
    scf.if %2 {
      %cst_53 = arith.constant 0.000000e+00 : f32
      %348 = vector.broadcast %cst_53 : f32 to vector<8x128xf32>
      %c0_54 = arith.constant 0 : index
      %c0_55 = arith.constant 0 : index
      %349 = vector.load %arg8[%c0_54, %c0_55] : memref<8x128xf32, #tpu.memory_space<vmem>>, vector<8x128xf32>
      tpu.vector_store %arg8[%c0_54, %c0_55], %348 {strides = array<i32>} : memref<8x128xf32, #tpu.memory_space<vmem>>, vector<8x128xf32>,
    } else {
    }
    %c0 = arith.constant 0 : index
    %c0_1 = arith.constant 0 : index
    %3 = vector.load %arg3[%c0, %c0_1] : memref<128x384xbf16, #tpu.memory_space<vmem>>, vector<128x384xbf16>
    %c0_2 = arith.constant 0 : index
    %c0_3 = arith.constant 0 : index
    %4 = vector.load %arg4[%c0_2, %c0_3] : memref<1x128xf32, #tpu.memory_space<vmem>>, vector<1x128xf32>
    %c0_4 = arith.constant 0 : index
    %c0_5 = arith.constant 0 : index
    %5 = vector.load %arg2[%c0_4, %c0_5] : memref<8x1xf32, #tpu.memory_space<vmem>>, vector<8x1xf32>
    %c8_i32 = arith.constant 8 : i32
    %6 = arith.muli %arg0, %c8_i32 : i32
    %c0_6 = arith.constant 0 : index
    %c0_7 = arith.constant 0 : index
    %7 = vector.load %arg8[%c0_6, %c0_7] : memref<8x128xf32, #tpu.memory_space<vmem>>, vector<8x128xf32>
    %c0_i32_8 = arith.constant 0 : i32
    %8 = arith.index_cast %c0_i32_8 : i32 to index
    %c0_9 = arith.constant 0 : index
    %c0_10 = arith.constant 0 : index
    %9 = vector.load %arg1[%8, %c0_9, %c0_10] : memref<8x8x384xbf16, #tpu.memory_space<vmem>>, vector<1x8x384xbf16>
    %10 = vector.shape_cast %9 : vector<1x8x384xbf16> to vector<8x384xbf16>
    %11 = arith.extf %10 : vector<8x384xbf16> to vector<8x384xf32>
    %12 = arith.truncf %7 : vector<8x128xf32> to vector<8x128xbf16>
    %cst = arith.constant dense<0.000000e+00> : vector<8x384xf32>
    %13 = tpu.matmul %12, %3, %cst {dimension_numbers = #tpu.dot_dimension_numbers<[1], [0], [0], [1], [0, 0, 1, 1], [], []>} : vector<8x128xbf16>, vector<128x384xbf16>, vector<8x384xf32> -> vector<8x384xf32>
    %14 = vector.extract_strided_slice %11 {offsets = [0, 0], sizes = [8, 128], strides = [1, 1]} : vector<8x384xf32> to vector<8x128xf32>
    %15 = vector.extract_strided_slice %13 {offsets = [0, 0], sizes = [8, 128], strides = [1, 1]} : vector<8x384xf32> to vector<8x128xf32>
    %16 = arith.addf %14, %15 : vector<8x128xf32>
    %17 = arith.negf %16 : vector<8x128xf32>
    %18 = math.exp %17 : vector<8x128xf32>
    %cst_11 = arith.constant 1.000000e+00 : f32
    %19 = vector.broadcast %cst_11 : f32 to vector<8x128xf32>
    %20 = arith.addf %19, %18 : vector<8x128xf32>
    %21 = arith.divf %19, %20 : vector<8x128xf32>
    %22 = vector.extract_strided_slice %11 {offsets = [0, 128], sizes = [8, 128], strides = [1, 1]} : vector<8x384xf32> to vector<8x128xf32>
    %23 = vector.extract_strided_slice %13 {offsets = [0, 128], sizes = [8, 128], strides = [1, 1]} : vector<8x384xf32> to vector<8x128xf32>
    %24 = arith.addf %22, %23 : vector<8x128xf32>
    %25 = arith.negf %24 : vector<8x128xf32>
    %26 = math.exp %25 : vector<8x128xf32>
    %cst_12 = arith.constant 1.000000e+00 : f32
    %27 = vector.broadcast %cst_12 : f32 to vector<8x128xf32>
    %28 = arith.addf %27, %26 : vector<8x128xf32>
    %29 = arith.divf %27, %28 : vector<8x128xf32>
    %30 = vector.extract_strided_slice %11 {offsets = [0, 256], sizes = [8, 128], strides = [1, 1]} : vector<8x384xf32> to vector<8x128xf32>
    %31 = vector.extract_strided_slice %13 {offsets = [0, 256], sizes = [8, 128], strides = [1, 1]} : vector<8x384xf32> to vector<8x128xf32>
    %32 = vector.broadcast %4 : vector<1x128xf32> to vector<8x128xf32>
    %33 = arith.addf %31, %32 : vector<8x128xf32>
    %34 = arith.mulf %21, %33 : vector<8x128xf32>
    %35 = arith.addf %30, %34 : vector<8x128xf32>
    %36 = math.tanh %35 : vector<8x128xf32>
    %37 = arith.subf %7, %36 : vector<8x128xf32>
    %38 = arith.mulf %29, %37 : vector<8x128xf32>
    %39 = arith.addf %36, %38 : vector<8x128xf32>
    %40 = arith.addi %6, %c0_i32_8 : i32
    %41 = arith.sitofp %40 : i32 to f32
    %42 = vector.broadcast %41 : f32 to vector<8x1xf32>
    %43 = arith.cmpf ogt, %5, %42 : vector<8x1xf32>
    %44 = arith.extui %43 : vector<8x1xi1> to vector<8x1xi32>
    %45 = arith.sitofp %44 : vector<8x1xi32> to vector<8x1xf32>
    %46 = arith.subf %39, %7 : vector<8x128xf32>
    %47 = vector.broadcast %45 : vector<8x1xf32> to vector<8x128xf32>
    %48 = arith.mulf %47, %46 : vector<8x128xf32>
    %49 = arith.addf %7, %48 : vector<8x128xf32>
    %c1_i32 = arith.constant 1 : i32
    %50 = arith.index_cast %c1_i32 : i32 to index
    %c0_13 = arith.constant 0 : index
    %c0_14 = arith.constant 0 : index
    %51 = vector.load %arg1[%50, %c0_13, %c0_14] : memref<8x8x384xbf16, #tpu.memory_space<vmem>>, vector<1x8x384xbf16>
    %52 = vector.shape_cast %51 : vector<1x8x384xbf16> to vector<8x384xbf16>
    %53 = arith.extf %52 : vector<8x384xbf16> to vector<8x384xf32>
    %54 = arith.truncf %49 : vector<8x128xf32> to vector<8x128xbf16>
    %cst_15 = arith.constant dense<0.000000e+00> : vector<8x384xf32>
    %55 = tpu.matmul %54, %3, %cst_15 {dimension_numbers = #tpu.dot_dimension_numbers<[1], [0], [0], [1], [0, 0, 1, 1], [], []>} : vector<8x128xbf16>, vector<128x384xbf16>, vector<8x384xf32> -> vector<8x384xf32>
    %56 = vector.extract_strided_slice %53 {offsets = [0, 0], sizes = [8, 128], strides = [1, 1]} : vector<8x384xf32> to vector<8x128xf32>
    %57 = vector.extract_strided_slice %55 {offsets = [0, 0], sizes = [8, 128], strides = [1, 1]} : vector<8x384xf32> to vector<8x128xf32>
    %58 = arith.addf %56, %57 : vector<8x128xf32>
    %59 = arith.negf %58 : vector<8x128xf32>
    %60 = math.exp %59 : vector<8x128xf32>
    %cst_16 = arith.constant 1.000000e+00 : f32
    %61 = vector.broadcast %cst_16 : f32 to vector<8x128xf32>
    %62 = arith.addf %61, %60 : vector<8x128xf32>
    %63 = arith.divf %61, %62 : vector<8x128xf32>
    %64 = vector.extract_strided_slice %53 {offsets = [0, 128], sizes = [8, 128], strides = [1, 1]} : vector<8x384xf32> to vector<8x128xf32>
    %65 = vector.extract_strided_slice %55 {offsets = [0, 128], sizes = [8, 128], strides = [1, 1]} : vector<8x384xf32> to vector<8x128xf32>
    %66 = arith.addf %64, %65 : vector<8x128xf32>
    %67 = arith.negf %66 : vector<8x128xf32>
    %68 = math.exp %67 : vector<8x128xf32>
    %cst_17 = arith.constant 1.000000e+00 : f32
    %69 = vector.broadcast %cst_17 : f32 to vector<8x128xf32>
    %70 = arith.addf %69, %68 : vector<8x128xf32>
    %71 = arith.divf %69, %70 : vector<8x128xf32>
    %72 = vector.extract_strided_slice %53 {offsets = [0, 256], sizes = [8, 128], strides = [1, 1]} : vector<8x384xf32> to vector<8x128xf32>
    %73 = vector.extract_strided_slice %55 {offsets = [0, 256], sizes = [8, 128], strides = [1, 1]} : vector<8x384xf32> to vector<8x128xf32>
    %74 = vector.broadcast %4 : vector<1x128xf32> to vector<8x128xf32>
    %75 = arith.addf %73, %74 : vector<8x128xf32>
    %76 = arith.mulf %63, %75 : vector<8x128xf32>
    %77 = arith.addf %72, %76 : vector<8x128xf32>
    %78 = math.tanh %77 : vector<8x128xf32>
    %79 = arith.subf %49, %78 : vector<8x128xf32>
    %80 = arith.mulf %71, %79 : vector<8x128xf32>
    %81 = arith.addf %78, %80 : vector<8x128xf32>
    %82 = arith.addi %6, %c1_i32 : i32
    %83 = arith.sitofp %82 : i32 to f32
    %84 = vector.broadcast %83 : f32 to vector<8x1xf32>
    %85 = arith.cmpf ogt, %5, %84 : vector<8x1xf32>
    %86 = arith.extui %85 : vector<8x1xi1> to vector<8x1xi32>
    %87 = arith.sitofp %86 : vector<8x1xi32> to vector<8x1xf32>
    %88 = arith.subf %81, %49 : vector<8x128xf32>
    %89 = vector.broadcast %87 : vector<8x1xf32> to vector<8x128xf32>
    %90 = arith.mulf %89, %88 : vector<8x128xf32>
    %91 = arith.addf %49, %90 : vector<8x128xf32>
    %c2_i32 = arith.constant 2 : i32
    %92 = arith.index_cast %c2_i32 : i32 to index
    %c0_18 = arith.constant 0 : index
    %c0_19 = arith.constant 0 : index
    %93 = vector.load %arg1[%92, %c0_18, %c0_19] : memref<8x8x384xbf16, #tpu.memory_space<vmem>>, vector<1x8x384xbf16>
    %94 = vector.shape_cast %93 : vector<1x8x384xbf16> to vector<8x384xbf16>
    %95 = arith.extf %94 : vector<8x384xbf16> to vector<8x384xf32>
    %96 = arith.truncf %91 : vector<8x128xf32> to vector<8x128xbf16>
    %cst_20 = arith.constant dense<0.000000e+00> : vector<8x384xf32>
    %97 = tpu.matmul %96, %3, %cst_20 {dimension_numbers = #tpu.dot_dimension_numbers<[1], [0], [0], [1], [0, 0, 1, 1], [], []>} : vector<8x128xbf16>, vector<128x384xbf16>, vector<8x384xf32> -> vector<8x384xf32>
    %98 = vector.extract_strided_slice %95 {offsets = [0, 0], sizes = [8, 128], strides = [1, 1]} : vector<8x384xf32> to vector<8x128xf32>
    %99 = vector.extract_strided_slice %97 {offsets = [0, 0], sizes = [8, 128], strides = [1, 1]} : vector<8x384xf32> to vector<8x128xf32>
    %100 = arith.addf %98, %99 : vector<8x128xf32>
    %101 = arith.negf %100 : vector<8x128xf32>
    %102 = math.exp %101 : vector<8x128xf32>
    %cst_21 = arith.constant 1.000000e+00 : f32
    %103 = vector.broadcast %cst_21 : f32 to vector<8x128xf32>
    %104 = arith.addf %103, %102 : vector<8x128xf32>
    %105 = arith.divf %103, %104 : vector<8x128xf32>
    %106 = vector.extract_strided_slice %95 {offsets = [0, 128], sizes = [8, 128], strides = [1, 1]} : vector<8x384xf32> to vector<8x128xf32>
    %107 = vector.extract_strided_slice %97 {offsets = [0, 128], sizes = [8, 128], strides = [1, 1]} : vector<8x384xf32> to vector<8x128xf32>
    %108 = arith.addf %106, %107 : vector<8x128xf32>
    %109 = arith.negf %108 : vector<8x128xf32>
    %110 = math.exp %109 : vector<8x128xf32>
    %cst_22 = arith.constant 1.000000e+00 : f32
    %111 = vector.broadcast %cst_22 : f32 to vector<8x128xf32>
    %112 = arith.addf %111, %110 : vector<8x128xf32>
    %113 = arith.divf %111, %112 : vector<8x128xf32>
    %114 = vector.extract_strided_slice %95 {offsets = [0, 256], sizes = [8, 128], strides = [1, 1]} : vector<8x384xf32> to vector<8x128xf32>
    %115 = vector.extract_strided_slice %97 {offsets = [0, 256], sizes = [8, 128], strides = [1, 1]} : vector<8x384xf32> to vector<8x128xf32>
    %116 = vector.broadcast %4 : vector<1x128xf32> to vector<8x128xf32>
    %117 = arith.addf %115, %116 : vector<8x128xf32>
    %118 = arith.mulf %105, %117 : vector<8x128xf32>
    %119 = arith.addf %114, %118 : vector<8x128xf32>
    %120 = math.tanh %119 : vector<8x128xf32>
    %121 = arith.subf %91, %120 : vector<8x128xf32>
    %122 = arith.mulf %113, %121 : vector<8x128xf32>
    %123 = arith.addf %120, %122 : vector<8x128xf32>
    %124 = arith.addi %6, %c2_i32 : i32
    %125 = arith.sitofp %124 : i32 to f32
    %126 = vector.broadcast %125 : f32 to vector<8x1xf32>
    %127 = arith.cmpf ogt, %5, %126 : vector<8x1xf32>
    %128 = arith.extui %127 : vector<8x1xi1> to vector<8x1xi32>
    %129 = arith.sitofp %128 : vector<8x1xi32> to vector<8x1xf32>
    %130 = arith.subf %123, %91 : vector<8x128xf32>
    %131 = vector.broadcast %129 : vector<8x1xf32> to vector<8x128xf32>
    %132 = arith.mulf %131, %130 : vector<8x128xf32>
    %133 = arith.addf %91, %132 : vector<8x128xf32>
    %c3_i32 = arith.constant 3 : i32
    %134 = arith.index_cast %c3_i32 : i32 to index
    %c0_23 = arith.constant 0 : index
    %c0_24 = arith.constant 0 : index
    %135 = vector.load %arg1[%134, %c0_23, %c0_24] : memref<8x8x384xbf16, #tpu.memory_space<vmem>>, vector<1x8x384xbf16>
    %136 = vector.shape_cast %135 : vector<1x8x384xbf16> to vector<8x384xbf16>
    %137 = arith.extf %136 : vector<8x384xbf16> to vector<8x384xf32>
    %138 = arith.truncf %133 : vector<8x128xf32> to vector<8x128xbf16>
    %cst_25 = arith.constant dense<0.000000e+00> : vector<8x384xf32>
    %139 = tpu.matmul %138, %3, %cst_25 {dimension_numbers = #tpu.dot_dimension_numbers<[1], [0], [0], [1], [0, 0, 1, 1], [], []>} : vector<8x128xbf16>, vector<128x384xbf16>, vector<8x384xf32> -> vector<8x384xf32>
    %140 = vector.extract_strided_slice %137 {offsets = [0, 0], sizes = [8, 128], strides = [1, 1]} : vector<8x384xf32> to vector<8x128xf32>
    %141 = vector.extract_strided_slice %139 {offsets = [0, 0], sizes = [8, 128], strides = [1, 1]} : vector<8x384xf32> to vector<8x128xf32>
    %142 = arith.addf %140, %141 : vector<8x128xf32>
    %143 = arith.negf %142 : vector<8x128xf32>
    %144 = math.exp %143 : vector<8x128xf32>
    %cst_26 = arith.constant 1.000000e+00 : f32
    %145 = vector.broadcast %cst_26 : f32 to vector<8x128xf32>
    %146 = arith.addf %145, %144 : vector<8x128xf32>
    %147 = arith.divf %145, %146 : vector<8x128xf32>
    %148 = vector.extract_strided_slice %137 {offsets = [0, 128], sizes = [8, 128], strides = [1, 1]} : vector<8x384xf32> to vector<8x128xf32>
    %149 = vector.extract_strided_slice %139 {offsets = [0, 128], sizes = [8, 128], strides = [1, 1]} : vector<8x384xf32> to vector<8x128xf32>
    %150 = arith.addf %148, %149 : vector<8x128xf32>
    %151 = arith.negf %150 : vector<8x128xf32>
    %152 = math.exp %151 : vector<8x128xf32>
    %cst_27 = arith.constant 1.000000e+00 : f32
    %153 = vector.broadcast %cst_27 : f32 to vector<8x128xf32>
    %154 = arith.addf %153, %152 : vector<8x128xf32>
    %155 = arith.divf %153, %154 : vector<8x128xf32>
    %156 = vector.extract_strided_slice %137 {offsets = [0, 256], sizes = [8, 128], strides = [1, 1]} : vector<8x384xf32> to vector<8x128xf32>
    %157 = vector.extract_strided_slice %139 {offsets = [0, 256], sizes = [8, 128], strides = [1, 1]} : vector<8x384xf32> to vector<8x128xf32>
    %158 = vector.broadcast %4 : vector<1x128xf32> to vector<8x128xf32>
    %159 = arith.addf %157, %158 : vector<8x128xf32>
    %160 = arith.mulf %147, %159 : vector<8x128xf32>
    %161 = arith.addf %156, %160 : vector<8x128xf32>
    %162 = math.tanh %161 : vector<8x128xf32>
    %163 = arith.subf %133, %162 : vector<8x128xf32>
    %164 = arith.mulf %155, %163 : vector<8x128xf32>
    %165 = arith.addf %162, %164 : vector<8x128xf32>
    %166 = arith.addi %6, %c3_i32 : i32
    %167 = arith.sitofp %166 : i32 to f32
    %168 = vector.broadcast %167 : f32 to vector<8x1xf32>
    %169 = arith.cmpf ogt, %5, %168 : vector<8x1xf32>
    %170 = arith.extui %169 : vector<8x1xi1> to vector<8x1xi32>
    %171 = arith.sitofp %170 : vector<8x1xi32> to vector<8x1xf32>
    %172 = arith.subf %165, %133 : vector<8x128xf32>
    %173 = vector.broadcast %171 : vector<8x1xf32> to vector<8x128xf32>
    %174 = arith.mulf %173, %172 : vector<8x128xf32>
    %175 = arith.addf %133, %174 : vector<8x128xf32>
    %c4_i32 = arith.constant 4 : i32
    %176 = arith.index_cast %c4_i32 : i32 to index
    %c0_28 = arith.constant 0 : index
    %c0_29 = arith.constant 0 : index
    %177 = vector.load %arg1[%176, %c0_28, %c0_29] : memref<8x8x384xbf16, #tpu.memory_space<vmem>>, vector<1x8x384xbf16>
    %178 = vector.shape_cast %177 : vector<1x8x384xbf16> to vector<8x384xbf16>
    %179 = arith.extf %178 : vector<8x384xbf16> to vector<8x384xf32>
    %180 = arith.truncf %175 : vector<8x128xf32> to vector<8x128xbf16>
    %cst_30 = arith.constant dense<0.000000e+00> : vector<8x384xf32>
    %181 = tpu.matmul %180, %3, %cst_30 {dimension_numbers = #tpu.dot_dimension_numbers<[1], [0], [0], [1], [0, 0, 1, 1], [], []>} : vector<8x128xbf16>, vector<128x384xbf16>, vector<8x384xf32> -> vector<8x384xf32>
    %182 = vector.extract_strided_slice %179 {offsets = [0, 0], sizes = [8, 128], strides = [1, 1]} : vector<8x384xf32> to vector<8x128xf32>
    %183 = vector.extract_strided_slice %181 {offsets = [0, 0], sizes = [8, 128], strides = [1, 1]} : vector<8x384xf32> to vector<8x128xf32>
    %184 = arith.addf %182, %183 : vector<8x128xf32>
    %185 = arith.negf %184 : vector<8x128xf32>
    %186 = math.exp %185 : vector<8x128xf32>
    %cst_31 = arith.constant 1.000000e+00 : f32
    %187 = vector.broadcast %cst_31 : f32 to vector<8x128xf32>
    %188 = arith.addf %187, %186 : vector<8x128xf32>
    %189 = arith.divf %187, %188 : vector<8x128xf32>
    %190 = vector.extract_strided_slice %179 {offsets = [0, 128], sizes = [8, 128], strides = [1, 1]} : vector<8x384xf32> to vector<8x128xf32>
    %191 = vector.extract_strided_slice %181 {offsets = [0, 128], sizes = [8, 128], strides = [1, 1]} : vector<8x384xf32> to vector<8x128xf32>
    %192 = arith.addf %190, %191 : vector<8x128xf32>
    %193 = arith.negf %192 : vector<8x128xf32>
    %194 = math.exp %193 : vector<8x128xf32>
    %cst_32 = arith.constant 1.000000e+00 : f32
    %195 = vector.broadcast %cst_32 : f32 to vector<8x128xf32>
    %196 = arith.addf %195, %194 : vector<8x128xf32>
    %197 = arith.divf %195, %196 : vector<8x128xf32>
    %198 = vector.extract_strided_slice %179 {offsets = [0, 256], sizes = [8, 128], strides = [1, 1]} : vector<8x384xf32> to vector<8x128xf32>
    %199 = vector.extract_strided_slice %181 {offsets = [0, 256], sizes = [8, 128], strides = [1, 1]} : vector<8x384xf32> to vector<8x128xf32>
    %200 = vector.broadcast %4 : vector<1x128xf32> to vector<8x128xf32>
    %201 = arith.addf %199, %200 : vector<8x128xf32>
    %202 = arith.mulf %189, %201 : vector<8x128xf32>
    %203 = arith.addf %198, %202 : vector<8x128xf32>
    %204 = math.tanh %203 : vector<8x128xf32>
    %205 = arith.subf %175, %204 : vector<8x128xf32>
    %206 = arith.mulf %197, %205 : vector<8x128xf32>
    %207 = arith.addf %204, %206 : vector<8x128xf32>
    %208 = arith.addi %6, %c4_i32 : i32
    %209 = arith.sitofp %208 : i32 to f32
    %210 = vector.broadcast %209 : f32 to vector<8x1xf32>
    %211 = arith.cmpf ogt, %5, %210 : vector<8x1xf32>
    %212 = arith.extui %211 : vector<8x1xi1> to vector<8x1xi32>
    %213 = arith.sitofp %212 : vector<8x1xi32> to vector<8x1xf32>
    %214 = arith.subf %207, %175 : vector<8x128xf32>
    %215 = vector.broadcast %213 : vector<8x1xf32> to vector<8x128xf32>
    %216 = arith.mulf %215, %214 : vector<8x128xf32>
    %217 = arith.addf %175, %216 : vector<8x128xf32>
    %c5_i32 = arith.constant 5 : i32
    %218 = arith.index_cast %c5_i32 : i32 to index
    %c0_33 = arith.constant 0 : index
    %c0_34 = arith.constant 0 : index
    %219 = vector.load %arg1[%218, %c0_33, %c0_34] : memref<8x8x384xbf16, #tpu.memory_space<vmem>>, vector<1x8x384xbf16>
    %220 = vector.shape_cast %219 : vector<1x8x384xbf16> to vector<8x384xbf16>
    %221 = arith.extf %220 : vector<8x384xbf16> to vector<8x384xf32>
    %222 = arith.truncf %217 : vector<8x128xf32> to vector<8x128xbf16>
    %cst_35 = arith.constant dense<0.000000e+00> : vector<8x384xf32>
    %223 = tpu.matmul %222, %3, %cst_35 {dimension_numbers = #tpu.dot_dimension_numbers<[1], [0], [0], [1], [0, 0, 1, 1], [], []>} : vector<8x128xbf16>, vector<128x384xbf16>, vector<8x384xf32> -> vector<8x384xf32>
    %224 = vector.extract_strided_slice %221 {offsets = [0, 0], sizes = [8, 128], strides = [1, 1]} : vector<8x384xf32> to vector<8x128xf32>
    %225 = vector.extract_strided_slice %223 {offsets = [0, 0], sizes = [8, 128], strides = [1, 1]} : vector<8x384xf32> to vector<8x128xf32>
    %226 = arith.addf %224, %225 : vector<8x128xf32>
    %227 = arith.negf %226 : vector<8x128xf32>
    %228 = math.exp %227 : vector<8x128xf32>
    %cst_36 = arith.constant 1.000000e+00 : f32
    %229 = vector.broadcast %cst_36 : f32 to vector<8x128xf32>
    %230 = arith.addf %229, %228 : vector<8x128xf32>
    %231 = arith.divf %229, %230 : vector<8x128xf32>
    %232 = vector.extract_strided_slice %221 {offsets = [0, 128], sizes = [8, 128], strides = [1, 1]} : vector<8x384xf32> to vector<8x128xf32>
    %233 = vector.extract_strided_slice %223 {offsets = [0, 128], sizes = [8, 128], strides = [1, 1]} : vector<8x384xf32> to vector<8x128xf32>
    %234 = arith.addf %232, %233 : vector<8x128xf32>
    %235 = arith.negf %234 : vector<8x128xf32>
    %236 = math.exp %235 : vector<8x128xf32>
    %cst_37 = arith.constant 1.000000e+00 : f32
    %237 = vector.broadcast %cst_37 : f32 to vector<8x128xf32>
    %238 = arith.addf %237, %236 : vector<8x128xf32>
    %239 = arith.divf %237, %238 : vector<8x128xf32>
    %240 = vector.extract_strided_slice %221 {offsets = [0, 256], sizes = [8, 128], strides = [1, 1]} : vector<8x384xf32> to vector<8x128xf32>
    %241 = vector.extract_strided_slice %223 {offsets = [0, 256], sizes = [8, 128], strides = [1, 1]} : vector<8x384xf32> to vector<8x128xf32>
    %242 = vector.broadcast %4 : vector<1x128xf32> to vector<8x128xf32>
    %243 = arith.addf %241, %242 : vector<8x128xf32>
    %244 = arith.mulf %231, %243 : vector<8x128xf32>
    %245 = arith.addf %240, %244 : vector<8x128xf32>
    %246 = math.tanh %245 : vector<8x128xf32>
    %247 = arith.subf %217, %246 : vector<8x128xf32>
    %248 = arith.mulf %239, %247 : vector<8x128xf32>
    %249 = arith.addf %246, %248 : vector<8x128xf32>
    %250 = arith.addi %6, %c5_i32 : i32
    %251 = arith.sitofp %250 : i32 to f32
    %252 = vector.broadcast %251 : f32 to vector<8x1xf32>
    %253 = arith.cmpf ogt, %5, %252 : vector<8x1xf32>
    %254 = arith.extui %253 : vector<8x1xi1> to vector<8x1xi32>
    %255 = arith.sitofp %254 : vector<8x1xi32> to vector<8x1xf32>
    %256 = arith.subf %249, %217 : vector<8x128xf32>
    %257 = vector.broadcast %255 : vector<8x1xf32> to vector<8x128xf32>
    %258 = arith.mulf %257, %256 : vector<8x128xf32>
    %259 = arith.addf %217, %258 : vector<8x128xf32>
    %c6_i32 = arith.constant 6 : i32
    %260 = arith.index_cast %c6_i32 : i32 to index
    %c0_38 = arith.constant 0 : index
    %c0_39 = arith.constant 0 : index
    %261 = vector.load %arg1[%260, %c0_38, %c0_39] : memref<8x8x384xbf16, #tpu.memory_space<vmem>>, vector<1x8x384xbf16>
    %262 = vector.shape_cast %261 : vector<1x8x384xbf16> to vector<8x384xbf16>
    %263 = arith.extf %262 : vector<8x384xbf16> to vector<8x384xf32>
    %264 = arith.truncf %259 : vector<8x128xf32> to vector<8x128xbf16>
    %cst_40 = arith.constant dense<0.000000e+00> : vector<8x384xf32>
    %265 = tpu.matmul %264, %3, %cst_40 {dimension_numbers = #tpu.dot_dimension_numbers<[1], [0], [0], [1], [0, 0, 1, 1], [], []>} : vector<8x128xbf16>, vector<128x384xbf16>, vector<8x384xf32> -> vector<8x384xf32>
    %266 = vector.extract_strided_slice %263 {offsets = [0, 0], sizes = [8, 128], strides = [1, 1]} : vector<8x384xf32> to vector<8x128xf32>
    %267 = vector.extract_strided_slice %265 {offsets = [0, 0], sizes = [8, 128], strides = [1, 1]} : vector<8x384xf32> to vector<8x128xf32>
    %268 = arith.addf %266, %267 : vector<8x128xf32>
    %269 = arith.negf %268 : vector<8x128xf32>
    %270 = math.exp %269 : vector<8x128xf32>
    %cst_41 = arith.constant 1.000000e+00 : f32
    %271 = vector.broadcast %cst_41 : f32 to vector<8x128xf32>
    %272 = arith.addf %271, %270 : vector<8x128xf32>
    %273 = arith.divf %271, %272 : vector<8x128xf32>
    %274 = vector.extract_strided_slice %263 {offsets = [0, 128], sizes = [8, 128], strides = [1, 1]} : vector<8x384xf32> to vector<8x128xf32>
    %275 = vector.extract_strided_slice %265 {offsets = [0, 128], sizes = [8, 128], strides = [1, 1]} : vector<8x384xf32> to vector<8x128xf32>
    %276 = arith.addf %274, %275 : vector<8x128xf32>
    %277 = arith.negf %276 : vector<8x128xf32>
    %278 = math.exp %277 : vector<8x128xf32>
    %cst_42 = arith.constant 1.000000e+00 : f32
    %279 = vector.broadcast %cst_42 : f32 to vector<8x128xf32>
    %280 = arith.addf %279, %278 : vector<8x128xf32>
    %281 = arith.divf %279, %280 : vector<8x128xf32>
    %282 = vector.extract_strided_slice %263 {offsets = [0, 256], sizes = [8, 128], strides = [1, 1]} : vector<8x384xf32> to vector<8x128xf32>
    %283 = vector.extract_strided_slice %265 {offsets = [0, 256], sizes = [8, 128], strides = [1, 1]} : vector<8x384xf32> to vector<8x128xf32>
    %284 = vector.broadcast %4 : vector<1x128xf32> to vector<8x128xf32>
    %285 = arith.addf %283, %284 : vector<8x128xf32>
    %286 = arith.mulf %273, %285 : vector<8x128xf32>
    %287 = arith.addf %282, %286 : vector<8x128xf32>
    %288 = math.tanh %287 : vector<8x128xf32>
    %289 = arith.subf %259, %288 : vector<8x128xf32>
    %290 = arith.mulf %281, %289 : vector<8x128xf32>
    %291 = arith.addf %288, %290 : vector<8x128xf32>
    %292 = arith.addi %6, %c6_i32 : i32
    %293 = arith.sitofp %292 : i32 to f32
    %294 = vector.broadcast %293 : f32 to vector<8x1xf32>
    %295 = arith.cmpf ogt, %5, %294 : vector<8x1xf32>
    %296 = arith.extui %295 : vector<8x1xi1> to vector<8x1xi32>
    %297 = arith.sitofp %296 : vector<8x1xi32> to vector<8x1xf32>
    %298 = arith.subf %291, %259 : vector<8x128xf32>
    %299 = vector.broadcast %297 : vector<8x1xf32> to vector<8x128xf32>
    %300 = arith.mulf %299, %298 : vector<8x128xf32>
    %301 = arith.addf %259, %300 : vector<8x128xf32>
    %c7_i32 = arith.constant 7 : i32
    %302 = arith.index_cast %c7_i32 : i32 to index
    %c0_43 = arith.constant 0 : index
    %c0_44 = arith.constant 0 : index
    %303 = vector.load %arg1[%302, %c0_43, %c0_44] : memref<8x8x384xbf16, #tpu.memory_space<vmem>>, vector<1x8x384xbf16>
    %304 = vector.shape_cast %303 : vector<1x8x384xbf16> to vector<8x384xbf16>
    %305 = arith.extf %304 : vector<8x384xbf16> to vector<8x384xf32>
    %306 = arith.truncf %301 : vector<8x128xf32> to vector<8x128xbf16>
    %cst_45 = arith.constant dense<0.000000e+00> : vector<8x384xf32>
    %307 = tpu.matmul %306, %3, %cst_45 {dimension_numbers = #tpu.dot_dimension_numbers<[1], [0], [0], [1], [0, 0, 1, 1], [], []>} : vector<8x128xbf16>, vector<128x384xbf16>, vector<8x384xf32> -> vector<8x384xf32>
    %308 = vector.extract_strided_slice %305 {offsets = [0, 0], sizes = [8, 128], strides = [1, 1]} : vector<8x384xf32> to vector<8x128xf32>
    %309 = vector.extract_strided_slice %307 {offsets = [0, 0], sizes = [8, 128], strides = [1, 1]} : vector<8x384xf32> to vector<8x128xf32>
    %310 = arith.addf %308, %309 : vector<8x128xf32>
    %311 = arith.negf %310 : vector<8x128xf32>
    %312 = math.exp %311 : vector<8x128xf32>
    %cst_46 = arith.constant 1.000000e+00 : f32
    %313 = vector.broadcast %cst_46 : f32 to vector<8x128xf32>
    %314 = arith.addf %313, %312 : vector<8x128xf32>
    %315 = arith.divf %313, %314 : vector<8x128xf32>
    %316 = vector.extract_strided_slice %305 {offsets = [0, 128], sizes = [8, 128], strides = [1, 1]} : vector<8x384xf32> to vector<8x128xf32>
    %317 = vector.extract_strided_slice %307 {offsets = [0, 128], sizes = [8, 128], strides = [1, 1]} : vector<8x384xf32> to vector<8x128xf32>
    %318 = arith.addf %316, %317 : vector<8x128xf32>
    %319 = arith.negf %318 : vector<8x128xf32>
    %320 = math.exp %319 : vector<8x128xf32>
    %cst_47 = arith.constant 1.000000e+00 : f32
    %321 = vector.broadcast %cst_47 : f32 to vector<8x128xf32>
    %322 = arith.addf %321, %320 : vector<8x128xf32>
    %323 = arith.divf %321, %322 : vector<8x128xf32>
    %324 = vector.extract_strided_slice %305 {offsets = [0, 256], sizes = [8, 128], strides = [1, 1]} : vector<8x384xf32> to vector<8x128xf32>
    %325 = vector.extract_strided_slice %307 {offsets = [0, 256], sizes = [8, 128], strides = [1, 1]} : vector<8x384xf32> to vector<8x128xf32>
    %326 = vector.broadcast %4 : vector<1x128xf32> to vector<8x128xf32>
    %327 = arith.addf %325, %326 : vector<8x128xf32>
    %328 = arith.mulf %315, %327 : vector<8x128xf32>
    %329 = arith.addf %324, %328 : vector<8x128xf32>
    %330 = math.tanh %329 : vector<8x128xf32>
    %331 = arith.subf %301, %330 : vector<8x128xf32>
    %332 = arith.mulf %323, %331 : vector<8x128xf32>
    %333 = arith.addf %330, %332 : vector<8x128xf32>
    %334 = arith.addi %6, %c7_i32 : i32
    %335 = arith.sitofp %334 : i32 to f32
    %336 = vector.broadcast %335 : f32 to vector<8x1xf32>
    %337 = arith.cmpf ogt, %5, %336 : vector<8x1xf32>
    %338 = arith.extui %337 : vector<8x1xi1> to vector<8x1xi32>
    %339 = arith.sitofp %338 : vector<8x1xi32> to vector<8x1xf32>
    %340 = arith.subf %333, %301 : vector<8x128xf32>
    %341 = vector.broadcast %339 : vector<8x1xf32> to vector<8x128xf32>
    %342 = arith.mulf %341, %340 : vector<8x128xf32>
    %343 = arith.addf %301, %342 : vector<8x128xf32>
    %c8_i32_48 = arith.constant 8 : i32
    %c0_49 = arith.constant 0 : index
    %c0_50 = arith.constant 0 : index
    %344 = vector.load %arg8[%c0_49, %c0_50] : memref<8x128xf32, #tpu.memory_space<vmem>>, vector<8x128xf32>
    tpu.vector_store %arg8[%c0_49, %c0_50], %343 {strides = array<i32>} : memref<8x128xf32, #tpu.memory_space<vmem>>, vector<8x128xf32>,
    %c0_i32_51 = arith.constant 0 : i32
    %345 = arith.cmpi eq, %arg0, %c0_i32_51 : i32
    %346 = arith.extui %345 : i1 to i32
    %c0_i32_52 = arith.constant 0 : i32
    %347 = arith.cmpi ne, %346, %c0_i32_52 : i32
    scf.if %347 {
      %c0_53 = arith.constant 0 : index
      %c0_54 = arith.constant 0 : index
      %348 = vector.load %arg8[%c0_53, %c0_54] : memref<8x128xf32, #tpu.memory_space<vmem>>, vector<8x128xf32>
      %c0_55 = arith.constant 0 : index
      %c0_56 = arith.constant 0 : index
      %349 = vector.load %arg5[%c0_55, %c0_56] : memref<1x128xf32, #tpu.memory_space<vmem>>, vector<1x128xf32>
      %350 = vector.broadcast %349 : vector<1x128xf32> to vector<8x128xf32>
      %351 = arith.mulf %348, %350 : vector<8x128xf32>
      %cst_57 = arith.constant dense<0.000000e+00> : vector<8xf32>
      %352 = vector.multi_reduction <add>, %351, %cst_57 [1] : vector<8x128xf32> to vector<8xf32>
      %353 = vector.shape_cast %352 : vector<8xf32> to vector<8x1xf32>
      %c0_58 = arith.constant 0 : index
      %c0_59 = arith.constant 0 : index
      %354 = memref.load %arg6[%c0_58, %c0_59] : memref<1x1xf32, #tpu.memory_space<smem>>
      %355 = vector.broadcast %354 : f32 to vector<8x1xf32>
      %356 = arith.addf %353, %355 : vector<8x1xf32>
      %357 = arith.negf %356 : vector<8x1xf32>
      %358 = math.exp %357 : vector<8x1xf32>
      %cst_60 = arith.constant 1.000000e+00 : f32
      %359 = vector.broadcast %cst_60 : f32 to vector<8x1xf32>
      %360 = arith.addf %359, %358 : vector<8x1xf32>
      %361 = arith.divf %359, %360 : vector<8x1xf32>
      %c0_61 = arith.constant 0 : index
      %c0_62 = arith.constant 0 : index
      %362 = vector.load %arg7[%c0_61, %c0_62] : memref<8x1xf32, #tpu.memory_space<vmem>>, vector<8x1xf32>
      tpu.vector_store %arg7[%c0_61, %c0_62], %361 {strides = array<i32>} : memref<8x1xf32, #tpu.memory_space<vmem>>, vector<8x1xf32>,
    } else {
    }
    return
  }
  func.func @transform_0(%arg0: i32) -> (i32, i32, i32) {
    %c0_i32 = arith.constant 0 : i32
    %c0_i32_0 = arith.constant 0 : i32
    %c0_i32_1 = arith.constant 0 : i32
    return %arg0, %c0_i32, %c0_i32_0 : i32, i32, i32
  }
  func.func @transform_1(%arg0: i32) -> (i32, i32) {
    %c0_i32 = arith.constant 0 : i32
    %c0_i32_0 = arith.constant 0 : i32
    %c0_i32_1 = arith.constant 0 : i32
    return %c0_i32, %c0_i32_0 : i32, i32
  }
  func.func @transform_2(%arg0: i32) -> (i32, i32) {
    %c0_i32 = arith.constant 0 : i32
    %c0_i32_0 = arith.constant 0 : i32
    %c0_i32_1 = arith.constant 0 : i32
    return %c0_i32, %c0_i32_0 : i32, i32
  }
  func.func @transform_3(%arg0: i32) -> (i32, i32) {
    %c0_i32 = arith.constant 0 : i32
    %c0_i32_0 = arith.constant 0 : i32
    %c0_i32_1 = arith.constant 0 : i32
    return %c0_i32, %c0_i32_0 : i32, i32
  }
  func.func @transform_4(%arg0: i32) -> (i32, i32) {
    %c0_i32 = arith.constant 0 : i32
    %c0_i32_0 = arith.constant 0 : i32
    %c0_i32_1 = arith.constant 0 : i32
    return %c0_i32, %c0_i32_0 : i32, i32
  }
  func.func @transform_5(%arg0: i32) -> (i32, i32) {
    %c0_i32 = arith.constant 0 : i32
    %c0_i32_0 = arith.constant 0 : i32
    %c0_i32_1 = arith.constant 0 : i32
    return %c0_i32, %c0_i32_0 : i32, i32
  }
  func.func @transform_6(%arg0: i32) -> (i32, i32) {
    %c0_i32 = arith.constant 0 : i32
    %c0_i32_0 = arith.constant 0 : i32
    %c0_i32_1 = arith.constant 0 : i32
    return %c0_i32, %c0_i32_0 : i32, i32
  }
}

</mosaic_0001>

<bundles_post_ra>
// kernel: rnn_forward.1
= control target key start
LH: loop header
LB: loop body
LE: loop exit
PB: predicated region body
PF: predicated region fallthrough
CT: control target
= control target key end

     0   :  { %v1652_v1 = vmov 0.0   ;;  %v1653_v2 = vmov 0   ;;  %vm1654_vm0 = vmmov 0   ;;  %v1655_v30 = vmov 0.0|0.0   ;;  %s2268_s2 = inlined_call_operand.vmem [shape: bf16[128,384], index: 2, kind: input, shape index: {}]   ;;  %s2269_s1 = inlined_call_operand.vmem [shape: f32[8,1], index: 1, kind: input, shape index: {}]   ;;  %s2270_s0 = inlined_call_operand.vmem [shape: bf16[8,8,384], index: 0, kind: input, shape index: {}]   ;;  %s2271_s3 = inlined_call_operand.vmem [shape: f32[1,128], index: 3, kind: input, shape index: {}]   ;;  %s2272_s4 = inlined_call_operand.vmem [shape: f32[1,128], index: 4, kind: input, shape index: {}]   ;;  %s2273_s5 = inlined_call_operand.<no memory space> [shape: f32[1,1], index: 5, kind: input, shape index: {}]   ;;  %s2274_s6 = inlined_call_operand.vmem [shape: f32[8,1], index: 6, kind: output, shape index: {}]  }
   0x1   :  { %v1694_v0 = vld [vmem:[%s2268_s2 + $0x4] ss:$12 sps:$4 sm:$0xff]   ;;  %1349 = vmatprep.subr.bf16.mxu1 %v1652_v1  ;;  %232 = vmatprep.mubr.bf16.mxu0 %v1653_v2  ;;  %v1701_v3 = vld [vmem:[%s2268_s2] ss:$12 sps:$4 sm:$0xff]   ;;  %v1710_v4 = vld [vmem:[%s2268_s2 + $0x1c] ss:$12 sps:$4 sm:$0xff]  }
   0x2   :  { %1365 = vmatprep.mubr.msk.bf16.mxu1 %vm1654_vm0, %v1652_v1  ;;  %1513 = vset.pattern.permute.xlu0 %v1653_v2  ;;  %v1717_v5 = vld [vmem:[%s2268_s2 + $0x18] ss:$12 sps:$4 sm:$0xff]   ;;  %v1723_v6 = vld [vmem:[%s2268_s2 + $0x34] ss:$12 sps:$4 sm:$0xff]   ;;  %v1729_v7 = vld [vmem:[%s2268_s2 + $0x30] ss:$12 sps:$4 sm:$0xff]  }
   0x3   :  { %200 = vmatprep.subr.bf16.mxu0 %v1694_v0  ;;  %1514 = vset.pattern.permute.xlu1 %v1653_v2  ;;  %v1735_v8 = vld [vmem:[%s2268_s2 + $0x4c] ss:$12 sps:$4 sm:$0xff]   ;;  %v1740_v9 = vld [vmem:[%s2268_s2 + $0x8] ss:$12 sps:$4 sm:$0xff]   ;;  %v1753_v11 = vld [vmem:[%s2268_s2 + $0x64] ss:$12 sps:$4 sm:$0xff]  }
   0x4   :  { %201 = vmatpush1.bf16.msra.mxu0 %v1701_v3  ;;  %v1746_v10 = vld [vmem:[%s2268_s2 + $0x48] ss:$12 sps:$4 sm:$0xff]   ;;  %1350 = vmatpush3.bf16.msra.mxu1 %v1740_v9  ;;  %v1759_v12 = vld [vmem:[%s2268_s2 + $0x20] ss:$12 sps:$4 sm:$0xff]   ;;  %v1771_v14 = vld [vmem:[%s2268_s2 + $0x38] ss:$12 sps:$4 sm:$0xff]  }
   0x5   :  { %202 = vmatprep.subr.bf16.mxu0 %v1710_v4  ;;  %1351 = vmatprep.subr.bf16.mxu1 %v1652_v1  ;;  %v1764_v13 = vld [vmem:[%s2268_s2 + $0x60] ss:$12 sps:$4 sm:$0xff]   ;;  %v1777_v15 = vld [vmem:[%s2268_s2 + $0x7c] ss:$12 sps:$4 sm:$0xff]   ;;  %v1789_v17 = vld [vmem:[%s2268_s2 + $0x78] ss:$12 sps:$4 sm:$0xff]  }
   0x6   :  { %v1783_v16 = vld [vmem:[%s2269_s1] sm:$0xff]  ;;  %v1795_v18 = vld [vmem:[%s2268_s2 + $0x50] ss:$12 sps:$4 sm:$0xff]   ;;  %v1818_v23 = vld [vmem:[%s2268_s2 + $0x68] ss:$12 sps:$4 sm:$0xff]   ;;  %vm1206_vm9 = vcmask 7168  }
   0x7   :  { %vm310_vm1 = vcmp.gt.f32.partialorder %v1783_v16, 0.0  ;;  %vm433_vm2 = vcmp.gt.f32.partialorder %v1783_v16, 1.0  ;;  %v1803_v19 = vld [vmem:[%s2268_s2 + $0x94] ss:$12 sps:$4 sm:$0xff]   ;;  %v1812_v22 = vld [vmem:[%s2268_s2 + $0x90] ss:$12 sps:$4 sm:$0xff]  }
   0x8   :  { %203 = vmatpush1.bf16.msra.mxu0 %v1717_v5  ;;  %1352 = vmatpush3.bf16.msra.mxu1 %v1759_v12  ;;  %v1239_v20 = vsel %vm310_vm1, 1.0, %v1652_v1  ;;  %v1244_v21 = vsel %vm433_vm2, 1.0, %v1652_v1  ;;  %vm802_vm3 = vcmp.gt.f32.partialorder %v1783_v16, 4.0  ;;  %v1825_v24 = vld [vmem:[%s2268_s2 + $0xac] ss:$12 sps:$4 sm:$0xff]   ;;  %vm1048_vm4 = vcmp.gt.f32.partialorder %v1783_v16, 6.0 }
   0x9   :  { %204 = vmatprep.subr.bf16.mxu0 %v1723_v6  ;;  %1353 = vmatprep.subr.bf16.mxu1 %v1652_v1  ;;  %v1259_v25 = vsel %vm802_vm3, 1.0, %v1652_v1  ;;  %v1833_v26 = vld [vmem:[%s2268_s2 + $0xa8] ss:$12 sps:$4 sm:$0xff]   ;;  %v1839_v27 = vld [vmem:[%s2268_s2 + $0x80] ss:$12 sps:$4 sm:$0xff]   ;;  %v1269_v28 = vsel %vm1048_vm4, 1.0, %v1652_v1 }
   0xa   :  { %316 = vperm.xlu0 %1513, %v1239_v20   ;;  %v1850_v29 = vld [vmem:[%s2268_s2 + $0x98] ss:$12 sps:$4 sm:$0xff]   ;;  %v1858_v31 = vld [vmem:[%s2268_s2 + $0xb0] ss:$12 sps:$4 sm:$0xff]   ;;  %v1904_v49 = vld [vmem:[%s2271_s3] ss:$0 sm:$0xff] }
   0xb   :  { %v66_v32 = vld [vmem:[%s2270_s0] sm:$0xff]  ;;  %v1909_v50 = vld [vmem:[%s2270_s0 + $0x8] ss:$12 sps:$4 sm:$0xff]   ;;  %vm556_vm5 = vcmp.gt.f32.partialorder %v1783_v16, 2.0  ;;  %vm679_vm6 = vcmp.gt.f32.partialorder %v1783_v16, 3.0  ;;  %vm925_vm7 = vcmp.gt.f32.partialorder %v1783_v16, 5.0 }
   0xc   :  { %205 = vmatpush1.bf16.msra.mxu0 %v1729_v7  ;;  %1354 = vmatpush3.bf16.msra.mxu1 %v1771_v14  ;;  %v68_v33 = vunpack.c.l.bf16 %v66_v32  ;;  %v69_v40 = vunpack.c.h.bf16 %v66_v32  ;;  %v70_v53 = vunpack.c.l.bf16 %v1909_v50  ;;  %vm1171_vm8 = vcmp.gt.f32.partialorder %v1783_v16, 7.0 }
   0xd   :  { %206 = vmatprep.subr.bf16.mxu0 %v1735_v8  ;;  %1355 = vmatprep.subr.bf16.mxu1 %v1652_v1  ;;  %v1274_v32 = vsel %vm1171_vm8, 1.0, %v1652_v1 }
   0xe   :  { %439 = vperm.xlu0 %1513, %v1244_v21  }
  0x10   :  { %207 = vmatpush1.bf16.msra.mxu0 %v1746_v10  ;;  %1356 = vmatpush3.bf16.msra.mxu1 %v1795_v18 }
  0x11   :  { %208 = vmatprep.subr.bf16.mxu0 %v1753_v11  ;;  %1357 = vmatprep.subr.bf16.mxu1 %v1652_v1 }
  0x12   :  { %808 = vperm.xlu0 %1513, %v1259_v25   ;;  %v1249_v25 = vsel %vm556_vm5, 1.0, %v1652_v1 }
  0x13   :  { %562 = vperm.xlu1 %1514, %v1249_v25  }
  0x14   :  { %209 = vmatpush1.bf16.msra.mxu0 %v1764_v13  ;;  %1358 = vmatpush3.bf16.msra.mxu1 %v1818_v23 }
  0x15   :  { %210 = vmatprep.subr.bf16.mxu0 %v1777_v15  ;;  %1359 = vmatprep.subr.bf16.mxu1 %v1652_v1 }
  0x16   :  { %1054 = vperm.xlu0 %1513, %v1269_v28   ;;  %v1254_v28 = vsel %vm679_vm6, 1.0, %v1652_v1 }
  0x17   :  { %685 = vperm.xlu1 %1514, %v1254_v28  }
  0x18   :  { %211 = vmatpush1.bf16.msra.mxu0 %v1789_v17  ;;  %1360 = vmatpush3.bf16.msra.mxu1 %v1839_v27 }
  0x19   :  { %212 = vmatprep.subr.bf16.mxu0 %v1803_v19  ;;  %1361 = vmatprep.subr.bf16.mxu1 %v1652_v1 }
  0x1c   :  { %213 = vmatpush1.bf16.msra.mxu0 %v1812_v22  ;;  %1362 = vmatpush3.bf16.msra.mxu1 %v1850_v29 }
  0x1d   :  { %214 = vmatprep.subr.bf16.mxu0 %v1825_v24  ;;  %1363 = vmatprep.subr.bf16.mxu1 %v1652_v1 }
  0x20   :  { %215 = vmatpush1.bf16.msra.mxu0 %v1833_v26  ;;  %1364 = vmatpush3.bf16.msra.mxu1 %v1858_v31 }
  0x21   :  { %328 = vmatprep.subr.bf16.mxu0 %v1694_v0  ;;  %1369 = vmatprep.subr.bf16.mxu1 %v1652_v1 }
  0x23   :  { %233 = vmatmul.mubr.bf16.vlgmr.msra.gmra.mrb[0].mxu0 %v1655_v30  ;;  %1366 = vmatmul.mubr.bf16.vlgmr.msra.gmra.mrb[0].mxu1 %v1655_v30  ;;  %v1264_v30 = vsel %vm925_vm7, 1.0, %v1652_v1 }
  0x24   :  { %329 = vmatpush1.bf16.msra.mxu0 %v1701_v3  ;;  %360 = vmatprep.mubr.bf16.mxu0 %v1653_v2 }
  0x25   :  { %330 = vmatprep.subr.bf16.mxu0 %v1710_v4  ;;  %1370 = vmatpush3.bf16.msra.mxu1 %v1740_v9 }
  0x26   :  { %1371 = vmatprep.subr.bf16.mxu1 %v1652_v1  ;;  %1385 = vmatprep.mubr.msk.bf16.mxu1 %vm1654_vm0, %v1652_v1 }
  0x27   :  { %931 = vperm.xlu1 %1514, %v1264_v30  }
  0x28   :  { %331 = vmatpush1.bf16.msra.mxu0 %v1717_v5 }
  0x29   :  { %332 = vmatprep.subr.bf16.mxu0 %v1723_v6  ;;  %1372 = vmatpush3.bf16.msra.mxu1 %v1759_v12 }
  0x2a   :  { %1373 = vmatprep.subr.bf16.mxu1 %v1652_v1 }
  0x2b   :  { %1177 = vperm.xlu1 %1514, %v1274_v32  }
  0x2c   :  { %333 = vmatpush1.bf16.msra.mxu0 %v1729_v7 }
  0x2d   :  { %334 = vmatprep.subr.bf16.mxu0 %v1735_v8  ;;  %1374 = vmatpush3.bf16.msra.mxu1 %v1771_v14 }
  0x2e   :  { %1375 = vmatprep.subr.bf16.mxu1 %v1652_v1 }
  0x30   :  { %335 = vmatpush1.bf16.msra.mxu0 %v1746_v10 }
  0x31   :  { %336 = vmatprep.subr.bf16.mxu0 %v1753_v11  ;;  %1376 = vmatpush3.bf16.msra.mxu1 %v1795_v18 }
  0x32   :  { %1377 = vmatprep.subr.bf16.mxu1 %v1652_v1 }
  0x34   :  { %337 = vmatpush1.bf16.msra.mxu0 %v1764_v13 }
  0x35   :  { %338 = vmatprep.subr.bf16.mxu0 %v1777_v15  ;;  %1378 = vmatpush3.bf16.msra.mxu1 %v1818_v23 }
  0x36   :  { %1379 = vmatprep.subr.bf16.mxu1 %v1652_v1 }
  0x38   :  { %339 = vmatpush1.bf16.msra.mxu0 %v1789_v17 }
  0x39   :  { %340 = vmatprep.subr.bf16.mxu0 %v1803_v19  ;;  %1380 = vmatpush3.bf16.msra.mxu1 %v1839_v27 }
  0x3a   :  { %1381 = vmatprep.subr.bf16.mxu1 %v1652_v1 }
  0x3c   :  { %341 = vmatpush1.bf16.msra.mxu0 %v1812_v22 }
  0x3d   :  { %342 = vmatprep.subr.bf16.mxu0 %v1825_v24  ;;  %1382 = vmatpush3.bf16.msra.mxu1 %v1850_v29 }
  0x3e   :  { %1383 = vmatprep.subr.bf16.mxu1 %v1652_v1 }
  0x40   :  { %343 = vmatpush1.bf16.msra.mxu0 %v1833_v26 }
  0x41   :  { %451 = vmatprep.subr.bf16.mxu0 %v1694_v0  ;;  %1384 = vmatpush3.bf16.msra.mxu1 %v1858_v31 }
  0x42   :  { %1389 = vmatprep.subr.bf16.mxu1 %v1652_v1 }
  0x89   :  { %v317_v63 = vpop.permute.xlu0 %316 }
  0xf6   :  { %v234_v34 = vpop.f32.mrb[0].mxu0  ;;  %v275_v41 = vpop.f32.mrb[0].mxu1 }
  0xf7   :  { %v281_v35 = vadd.f32 %v234_v34, %v68_v33  ;;  %v236_v36 = vpop.f32.mrb[1].mxu0  ;;  %v1367_v43 = vpop.f32.mrb[1].mxu1  ;;  %v301_v51 = vadd.f32 %v1904_v49, %v275_v41  ;;  %v1240_v33 = vld [vmem:[%s2270_s0 + $0xc] sm:$0xff] }
  0xf8   :  { %v238_v37 = vpop.f32.mrb[2].mxu0  ;;  %v288_v42 = vadd.f32 %v236_v36, %v69_v40  ;;  %v278_v44 = vpop.f32.mrb[2].mxu1  ;;  %v324_v34 = vunpack.c.l.bf16 %v1240_v33  ;;  %v325_v16 = vunpack.c.h.bf16 %v1240_v33 }
  0xf9   :  { %v1236_v38 = vmul.f32 -1.442695, %v281_v35  ;;  %v239_v39 = vpop.f32.mrb[3].mxu0  ;;  %v1368_v45 = vpop.f32.mrb[3].mxu1 }
  0xfa   :  { %v1237_v46 = vmul.f32 -1.442695, %v288_v42 }
  0xfb   :  { %1547 = vpow2.f32 %v1236_v38 }
  0xfc   :  { %1549 = vpow2.f32 %v1237_v46 }
 0x105   :  { %v1548_v47 = vpop.eup %1547 }
 0x106   :  { %v285_v48 = vadd.f32 1.0, %v1548_v47  ;;  %v1550_v52 = vpop.eup %1549 }
 0x107   :  { %v292_v56 = vadd.f32 1.0, %v1550_v52  ;;  %v326_v52 = vunpack.c.h.bf16 %v1909_v50 }
 0x108   :  { %1551 = vrcp.f32 %v285_v48 }
 0x112   :  { %v1552_v54 = vpop.eup %1551 }
 0x113   :  { %v302_v55 = vmul.f32 %v1552_v54, %v301_v51 }
 0x115   :  { %v303_v57 = vadd.f32 %v302_v55, %v70_v53 }
 0x117   :  { %1553 = vtanh.f32 %v303_v57 }
 0x118   :  { %1555 = vrcp.f32 %v292_v56 }
 0x121   :  { %v1554_v58 = vpop.eup %1553 }
 0x122   :  { %v305_v59 = vsub.f32 0.0, %v1554_v58  ;;  %v1556_v60 = vpop.eup %1555 }
 0x124   :  { %v306_v61 = vmul.f32 %v1556_v60, %v305_v59 }
 0x126   :  { %v307_v62 = vadd.f32 %v1554_v58, %v306_v61 }
 0x128   :  { %v1913_v20 = vmul.f32 %v317_v63, %v307_v62 }
 0x12a   :  { %v327_v21 = vpack.c.bf16 %v1913_v20, %v1913_v20 }
 0x12c   :  { %361 = vmatmul.mubr.bf16.vlgmr.msra.gmra.mrb[4].mxu0 %v327_v21  ;;  %1386 = vmatmul.mubr.bf16.vlgmr.msra.gmra.mrb[4].mxu1 %v327_v21  ;;  %v440_v21 = vpop.permute.xlu0 %439 }
 0x12d   :  { %452 = vmatpush1.bf16.msra.mxu0 %v1701_v3  ;;  %1390 = vmatpush3.bf16.msra.mxu1 %v1740_v9 }
 0x12e   :  { %453 = vmatprep.subr.bf16.mxu0 %v1710_v4  ;;  %1391 = vmatprep.subr.bf16.mxu1 %v1652_v1 }
 0x12f   :  { %483 = vmatprep.mubr.bf16.mxu0 %v1653_v2  ;;  %1405 = vmatprep.mubr.msk.bf16.mxu1 %vm1654_vm0, %v1652_v1 }
 0x131   :  { %454 = vmatpush1.bf16.msra.mxu0 %v1717_v5  ;;  %1392 = vmatpush3.bf16.msra.mxu1 %v1759_v12 }
 0x132   :  { %455 = vmatprep.subr.bf16.mxu0 %v1723_v6  ;;  %1393 = vmatprep.subr.bf16.mxu1 %v1652_v1 }
 0x135   :  { %456 = vmatpush1.bf16.msra.mxu0 %v1729_v7  ;;  %1394 = vmatpush3.bf16.msra.mxu1 %v1771_v14 }
 0x136   :  { %457 = vmatprep.subr.bf16.mxu0 %v1735_v8  ;;  %1395 = vmatprep.subr.bf16.mxu1 %v1652_v1 }
 0x139   :  { %458 = vmatpush1.bf16.msra.mxu0 %v1746_v10  ;;  %1396 = vmatpush3.bf16.msra.mxu1 %v1795_v18 }
 0x13a   :  { %459 = vmatprep.subr.bf16.mxu0 %v1753_v11  ;;  %1397 = vmatprep.subr.bf16.mxu1 %v1652_v1 }
 0x13d   :  { %460 = vmatpush1.bf16.msra.mxu0 %v1764_v13  ;;  %1398 = vmatpush3.bf16.msra.mxu1 %v1818_v23 }
 0x13e   :  { %461 = vmatprep.subr.bf16.mxu0 %v1777_v15  ;;  %1399 = vmatprep.subr.bf16.mxu1 %v1652_v1 }
 0x141   :  { %462 = vmatpush1.bf16.msra.mxu0 %v1789_v17  ;;  %1400 = vmatpush3.bf16.msra.mxu1 %v1839_v27 }
 0x142   :  { %463 = vmatprep.subr.bf16.mxu0 %v1803_v19  ;;  %1401 = vmatprep.subr.bf16.mxu1 %v1652_v1 }
 0x145   :  { %464 = vmatpush1.bf16.msra.mxu0 %v1812_v22  ;;  %1402 = vmatpush3.bf16.msra.mxu1 %v1850_v29 }
 0x146   :  { %465 = vmatprep.subr.bf16.mxu0 %v1825_v24  ;;  %1403 = vmatprep.subr.bf16.mxu1 %v1652_v1 }
 0x149   :  { %466 = vmatpush1.bf16.msra.mxu0 %v1833_v26  ;;  %1404 = vmatpush3.bf16.msra.mxu1 %v1858_v31 }
 0x14a   :  { %574 = vmatprep.subr.bf16.mxu0 %v1694_v0  ;;  %1409 = vmatprep.subr.bf16.mxu1 %v1652_v1 }
 0x1ff   :  { %v362_v35 = vpop.f32.mrb[4].mxu0  ;;  %v403_v36 = vpop.f32.mrb[4].mxu1 }
 0x200   :  { %v409_v37 = vadd.f32 %v362_v35, %v324_v34  ;;  %v364_v38 = vpop.f32.mrb[5].mxu0  ;;  %v1387_v39 = vpop.f32.mrb[5].mxu1  ;;  %v423_v53 = vadd.f32 %v1904_v49, %v403_v36 }
 0x201   :  { %v366_v40 = vpop.f32.mrb[6].mxu0  ;;  %v406_v41 = vpop.f32.mrb[6].mxu1  ;;  %v416_v45 = vadd.f32 %v364_v38, %v325_v16 }
 0x202   :  { %v1242_v42 = vmul.f32 -1.442695, %v409_v37  ;;  %v367_v43 = vpop.f32.mrb[7].mxu0  ;;  %v1388_v44 = vpop.f32.mrb[7].mxu1 }
 0x203   :  { %v1243_v46 = vmul.f32 -1.442695, %v416_v45 }
 0x204   :  { %1557 = vpow2.f32 %v1242_v42 }
 0x205   :  { %1559 = vpow2.f32 %v1243_v46  ;;  %v2013_v46 = vld [vmem:[%s2270_s0 + $0x20] ss:$12 sps:$4 sm:$0xff]  }
 0x20e   :  { %v1558_v47 = vpop.eup %1557 }
 0x20f   :  { %v413_v48 = vadd.f32 1.0, %v1558_v47  ;;  %v1560_v51 = vpop.eup %1559 }
 0x210   :  { %v420_v57 = vadd.f32 1.0, %v1560_v51 }
 0x211   :  { %1561 = vrcp.f32 %v413_v48  ;;  %v449_v48 = vunpack.c.l.bf16 %v2013_v46 }
 0x21b   :  { %v1562_v54 = vpop.eup %1561 }
 0x21c   :  { %v424_v55 = vmul.f32 %v1562_v54, %v423_v53 }
 0x21e   :  { %v425_v56 = vadd.f32 %v424_v55, %v326_v52 }
 0x220   :  { %1563 = vtanh.f32 %v425_v56 }
 0x221   :  { %1565 = vrcp.f32 %v420_v57 }
 0x22a   :  { %v1564_v58 = vpop.eup %1563 }
 0x22b   :  { %v427_v59 = vsub.f32 %v1913_v20, %v1564_v58  ;;  %v1566_v60 = vpop.eup %1565 }
 0x22d   :  { %v428_v61 = vmul.f32 %v1566_v60, %v427_v59 }
 0x22f   :  { %v429_v62 = vadd.f32 %v1564_v58, %v428_v61 }
 0x231   :  { %v436_v63 = vsub.f32 %v429_v62, %v1913_v20  ;;  %v563_v62 = vpop.permute.xlu1 %562 }
 0x233   :  { %v442_v25 = vmul.f32 %v440_v21, %v436_v63 }
 0x235   :  { %v1968_v50 = vadd.f32 %v442_v25, %v1913_v20  ;;  %v1245_v20 = vld [vmem:[%s2270_s0 + $0x18] sm:$0xff] }
 0x236   :  { %v447_v30 = vunpack.c.l.bf16 %v1245_v20  ;;  %v448_v42 = vunpack.c.h.bf16 %v1245_v20 }
 0x237   :  { %v450_v28 = vpack.c.bf16 %v1968_v50, %v1968_v50 }
 0x239   :  { %484 = vmatmul.mubr.bf16.vlgmr.msra.gmra.mrb[8].mxu0 %v450_v28  ;;  %1406 = vmatmul.mubr.bf16.vlgmr.msra.gmra.mrb[8].mxu1 %v450_v28 }
 0x23a   :  { %575 = vmatpush1.bf16.msra.mxu0 %v1701_v3  ;;  %1410 = vmatpush3.bf16.msra.mxu1 %v1740_v9 }
 0x23b   :  { %576 = vmatprep.subr.bf16.mxu0 %v1710_v4  ;;  %1411 = vmatprep.subr.bf16.mxu1 %v1652_v1 }
 0x23c   :  { %606 = vmatprep.mubr.bf16.mxu0 %v1653_v2  ;;  %1425 = vmatprep.mubr.msk.bf16.mxu1 %vm1654_vm0, %v1652_v1 }
 0x23e   :  { %577 = vmatpush1.bf16.msra.mxu0 %v1717_v5  ;;  %1412 = vmatpush3.bf16.msra.mxu1 %v1759_v12 }
 0x23f   :  { %578 = vmatprep.subr.bf16.mxu0 %v1723_v6  ;;  %1413 = vmatprep.subr.bf16.mxu1 %v1652_v1 }
 0x242   :  { %579 = vmatpush1.bf16.msra.mxu0 %v1729_v7  ;;  %1414 = vmatpush3.bf16.msra.mxu1 %v1771_v14 }
 0x243   :  { %580 = vmatprep.subr.bf16.mxu0 %v1735_v8  ;;  %1415 = vmatprep.subr.bf16.mxu1 %v1652_v1 }
 0x246   :  { %581 = vmatpush1.bf16.msra.mxu0 %v1746_v10  ;;  %1416 = vmatpush3.bf16.msra.mxu1 %v1795_v18 }
 0x247   :  { %582 = vmatprep.subr.bf16.mxu0 %v1753_v11  ;;  %1417 = vmatprep.subr.bf16.mxu1 %v1652_v1 }
 0x24a   :  { %583 = vmatpush1.bf16.msra.mxu0 %v1764_v13  ;;  %1418 = vmatpush3.bf16.msra.mxu1 %v1818_v23 }
 0x24b   :  { %584 = vmatprep.subr.bf16.mxu0 %v1777_v15  ;;  %1419 = vmatprep.subr.bf16.mxu1 %v1652_v1 }
 0x24e   :  { %585 = vmatpush1.bf16.msra.mxu0 %v1789_v17  ;;  %1420 = vmatpush3.bf16.msra.mxu1 %v1839_v27 }
 0x24f   :  { %586 = vmatprep.subr.bf16.mxu0 %v1803_v19  ;;  %1421 = vmatprep.subr.bf16.mxu1 %v1652_v1 }
 0x252   :  { %587 = vmatpush1.bf16.msra.mxu0 %v1812_v22  ;;  %1422 = vmatpush3.bf16.msra.mxu1 %v1850_v29 }
 0x253   :  { %588 = vmatprep.subr.bf16.mxu0 %v1825_v24  ;;  %1423 = vmatprep.subr.bf16.mxu1 %v1652_v1 }
 0x256   :  { %589 = vmatpush1.bf16.msra.mxu0 %v1833_v26  ;;  %1424 = vmatpush3.bf16.msra.mxu1 %v1858_v31 }
 0x257   :  { %697 = vmatprep.subr.bf16.mxu0 %v1694_v0  ;;  %1429 = vmatprep.subr.bf16.mxu1 %v1652_v1 }
 0x30c   :  { %v485_v32 = vpop.f32.mrb[8].mxu0  ;;  %v526_v33 = vpop.f32.mrb[8].mxu1 }
 0x30d   :  { %v532_v34 = vadd.f32 %v485_v32, %v447_v30  ;;  %v487_v35 = vpop.f32.mrb[9].mxu0  ;;  %v1407_v36 = vpop.f32.mrb[9].mxu1  ;;  %v546_v51 = vadd.f32 %v1904_v49, %v526_v33 }
 0x30e   :  { %v489_v37 = vpop.f32.mrb[10].mxu0  ;;  %v529_v38 = vpop.f32.mrb[10].mxu1  ;;  %v539_v43 = vadd.f32 %v487_v35, %v448_v42 }
 0x30f   :  { %v1247_v39 = vmul.f32 -1.442695, %v532_v34  ;;  %v490_v40 = vpop.f32.mrb[11].mxu0  ;;  %v1408_v41 = vpop.f32.mrb[11].mxu1 }
 0x310   :  { %v1248_v44 = vmul.f32 -1.442695, %v539_v43 }
 0x311   :  { %1567 = vpow2.f32 %v1247_v39 }
 0x312   :  { %1569 = vpow2.f32 %v1248_v44 }
 0x31b   :  { %v1568_v16 = vpop.eup %1567 }
 0x31c   :  { %v536_v45 = vadd.f32 1.0, %v1568_v16  ;;  %v1570_v47 = vpop.eup %1569 }
 0x31d   :  { %v543_v55 = vadd.f32 1.0, %v1570_v47 }
 0x31e   :  { %1571 = vrcp.f32 %v536_v45  ;;  %v572_v45 = vunpack.c.h.bf16 %v2013_v46 }
 0x328   :  { %v1572_v52 = vpop.eup %1571 }
 0x329   :  { %v547_v53 = vmul.f32 %v1572_v52, %v546_v51 }
 0x32b   :  { %v548_v54 = vadd.f32 %v547_v53, %v449_v48 }
 0x32d   :  { %1573 = vtanh.f32 %v548_v54 }
 0x32e   :  { %1575 = vrcp.f32 %v543_v55 }
 0x337   :  { %v1574_v56 = vpop.eup %1573 }
 0x338   :  { %v550_v57 = vsub.f32 %v1968_v50, %v1574_v56  ;;  %v1576_v58 = vpop.eup %1575 }
 0x33a   :  { %v551_v59 = vmul.f32 %v1576_v58, %v550_v57 }
 0x33c   :  { %v552_v60 = vadd.f32 %v1574_v56, %v551_v59 }
 0x33e   :  { %v559_v61 = vsub.f32 %v552_v60, %v1968_v50  ;;  %v686_v60 = vpop.permute.xlu1 %685 }
 0x340   :  { %v565_v63 = vmul.f32 %v563_v62, %v559_v61 }
 0x342   :  { %v2020_v21 = vadd.f32 %v565_v63, %v1968_v50  ;;  %v1250_v50 = vld [vmem:[%s2270_s0 + $0x24] sm:$0xff]  ;;  %v1255_v63 = vld [vmem:[%s2270_s0 + $0x30] sm:$0xff] }
 0x343   :  { %v570_v28 = vunpack.c.l.bf16 %v1250_v50  ;;  %v571_v40 = vunpack.c.h.bf16 %v1250_v50 }
 0x344   :  { %v573_v25 = vpack.c.bf16 %v2020_v21, %v2020_v21 }
 0x346   :  { %607 = vmatmul.mubr.bf16.vlgmr.msra.gmra.mrb[12].mxu0 %v573_v25  ;;  %1426 = vmatmul.mubr.bf16.vlgmr.msra.gmra.mrb[12].mxu1 %v573_v25 }
 0x347   :  { %698 = vmatpush1.bf16.msra.mxu0 %v1701_v3  ;;  %1430 = vmatpush3.bf16.msra.mxu1 %v1740_v9 }
 0x348   :  { %699 = vmatprep.subr.bf16.mxu0 %v1710_v4  ;;  %1431 = vmatprep.subr.bf16.mxu1 %v1652_v1 }
 0x349   :  { %729 = vmatprep.mubr.bf16.mxu0 %v1653_v2  ;;  %1445 = vmatprep.mubr.msk.bf16.mxu1 %vm1654_vm0, %v1652_v1 }
 0x34b   :  { %700 = vmatpush1.bf16.msra.mxu0 %v1717_v5  ;;  %1432 = vmatpush3.bf16.msra.mxu1 %v1759_v12 }
 0x34c   :  { %701 = vmatprep.subr.bf16.mxu0 %v1723_v6  ;;  %1433 = vmatprep.subr.bf16.mxu1 %v1652_v1 }
 0x34f   :  { %702 = vmatpush1.bf16.msra.mxu0 %v1729_v7  ;;  %1434 = vmatpush3.bf16.msra.mxu1 %v1771_v14 }
 0x350   :  { %703 = vmatprep.subr.bf16.mxu0 %v1735_v8  ;;  %1435 = vmatprep.subr.bf16.mxu1 %v1652_v1 }
 0x353   :  { %704 = vmatpush1.bf16.msra.mxu0 %v1746_v10  ;;  %1436 = vmatpush3.bf16.msra.mxu1 %v1795_v18 }
 0x354   :  { %705 = vmatprep.subr.bf16.mxu0 %v1753_v11  ;;  %1437 = vmatprep.subr.bf16.mxu1 %v1652_v1 }
 0x357   :  { %706 = vmatpush1.bf16.msra.mxu0 %v1764_v13  ;;  %1438 = vmatpush3.bf16.msra.mxu1 %v1818_v23 }
 0x358   :  { %707 = vmatprep.subr.bf16.mxu0 %v1777_v15  ;;  %1439 = vmatprep.subr.bf16.mxu1 %v1652_v1 }
 0x35b   :  { %708 = vmatpush1.bf16.msra.mxu0 %v1789_v17  ;;  %1440 = vmatpush3.bf16.msra.mxu1 %v1839_v27 }
 0x35c   :  { %709 = vmatprep.subr.bf16.mxu0 %v1803_v19  ;;  %1441 = vmatprep.subr.bf16.mxu1 %v1652_v1 }
 0x35f   :  { %710 = vmatpush1.bf16.msra.mxu0 %v1812_v22  ;;  %1442 = vmatpush3.bf16.msra.mxu1 %v1850_v29 }
 0x360   :  { %711 = vmatprep.subr.bf16.mxu0 %v1825_v24  ;;  %1443 = vmatprep.subr.bf16.mxu1 %v1652_v1 }
 0x363   :  { %712 = vmatpush1.bf16.msra.mxu0 %v1833_v26  ;;  %1444 = vmatpush3.bf16.msra.mxu1 %v1858_v31 }
 0x364   :  { %820 = vmatprep.subr.bf16.mxu0 %v1694_v0  ;;  %1449 = vmatprep.subr.bf16.mxu1 %v1652_v1 }
 0x419   :  { %v608_v20 = vpop.f32.mrb[12].mxu0  ;;  %v649_v30 = vpop.f32.mrb[12].mxu1 }
 0x41a   :  { %v655_v32 = vadd.f32 %v608_v20, %v570_v28  ;;  %v610_v33 = vpop.f32.mrb[13].mxu0  ;;  %v1427_v34 = vpop.f32.mrb[13].mxu1  ;;  %v669_v47 = vadd.f32 %v1904_v49, %v649_v30 }
 0x41b   :  { %v612_v35 = vpop.f32.mrb[14].mxu0  ;;  %v652_v36 = vpop.f32.mrb[14].mxu1  ;;  %v662_v41 = vadd.f32 %v610_v33, %v571_v40 }
 0x41c   :  { %v1252_v37 = vmul.f32 -1.442695, %v655_v32  ;;  %v613_v38 = vpop.f32.mrb[15].mxu0  ;;  %v1428_v39 = vpop.f32.mrb[15].mxu1 }
 0x41d   :  { %v1253_v42 = vmul.f32 -1.442695, %v662_v41  ;;  %v2112_v41 = vld [vmem:[%s2270_s0 + $0x38] ss:$12 sps:$4 sm:$0xff]  }
 0x41e   :  { %1577 = vpow2.f32 %v1252_v37  ;;  %v694_v37 = vunpack.c.h.bf16 %v1255_v63 }
 0x41f   :  { %1579 = vpow2.f32 %v1253_v42 }
 0x428   :  { %v1578_v43 = vpop.eup %1577 }
 0x429   :  { %v659_v44 = vadd.f32 1.0, %v1578_v43  ;;  %v1580_v16 = vpop.eup %1579  ;;  %v695_v43 = vunpack.c.l.bf16 %v2112_v41 }
 0x42a   :  { %v666_v53 = vadd.f32 1.0, %v1580_v16 }
 0x42b   :  { %1581 = vrcp.f32 %v659_v44 }
 0x435   :  { %v1582_v48 = vpop.eup %1581 }
 0x436   :  { %v670_v51 = vmul.f32 %v1582_v48, %v669_v47 }
 0x438   :  { %v671_v52 = vadd.f32 %v670_v51, %v572_v45 }
 0x43a   :  { %1583 = vtanh.f32 %v671_v52 }
 0x43b   :  { %1585 = vrcp.f32 %v666_v53 }
 0x444   :  { %v1584_v54 = vpop.eup %1583 }
 0x445   :  { %v673_v55 = vsub.f32 %v2020_v21, %v1584_v54  ;;  %v1586_v56 = vpop.eup %1585 }
 0x447   :  { %v674_v57 = vmul.f32 %v1586_v56, %v673_v55 }
 0x449   :  { %v675_v58 = vadd.f32 %v1584_v54, %v674_v57  ;;  %v809_v57 = vpop.permute.xlu0 %808 }
 0x44b   :  { %v682_v59 = vsub.f32 %v675_v58, %v2020_v21 }
 0x44d   :  { %v688_v61 = vmul.f32 %v686_v60, %v682_v59 }
 0x44f   :  { %v2067_v46 = vadd.f32 %v688_v61, %v2020_v21  ;;  %v693_v21 = vunpack.c.l.bf16 %v1255_v63 }
 0x451   :  { %v696_v62 = vpack.c.bf16 %v2067_v46, %v2067_v46 }
 0x453   :  { %730 = vmatmul.mubr.bf16.vlgmr.msra.gmra.mrb[16].mxu0 %v696_v62  ;;  %1446 = vmatmul.mubr.bf16.vlgmr.msra.gmra.mrb[16].mxu1 %v696_v62 }
 0x454   :  { %821 = vmatpush1.bf16.msra.mxu0 %v1701_v3  ;;  %1450 = vmatpush3.bf16.msra.mxu1 %v1740_v9 }
 0x455   :  { %822 = vmatprep.subr.bf16.mxu0 %v1710_v4  ;;  %1451 = vmatprep.subr.bf16.mxu1 %v1652_v1 }
 0x456   :  { %852 = vmatprep.mubr.bf16.mxu0 %v1653_v2  ;;  %1465 = vmatprep.mubr.msk.bf16.mxu1 %vm1654_vm0, %v1652_v1 }
 0x458   :  { %823 = vmatpush1.bf16.msra.mxu0 %v1717_v5  ;;  %1452 = vmatpush3.bf16.msra.mxu1 %v1759_v12 }
 0x459   :  { %824 = vmatprep.subr.bf16.mxu0 %v1723_v6  ;;  %1453 = vmatprep.subr.bf16.mxu1 %v1652_v1 }
 0x45c   :  { %825 = vmatpush1.bf16.msra.mxu0 %v1729_v7  ;;  %1454 = vmatpush3.bf16.msra.mxu1 %v1771_v14 }
 0x45d   :  { %826 = vmatprep.subr.bf16.mxu0 %v1735_v8  ;;  %1455 = vmatprep.subr.bf16.mxu1 %v1652_v1 }
 0x460   :  { %827 = vmatpush1.bf16.msra.mxu0 %v1746_v10  ;;  %1456 = vmatpush3.bf16.msra.mxu1 %v1795_v18 }
 0x461   :  { %828 = vmatprep.subr.bf16.mxu0 %v1753_v11  ;;  %1457 = vmatprep.subr.bf16.mxu1 %v1652_v1 }
 0x464   :  { %829 = vmatpush1.bf16.msra.mxu0 %v1764_v13  ;;  %1458 = vmatpush3.bf16.msra.mxu1 %v1818_v23 }
 0x465   :  { %830 = vmatprep.subr.bf16.mxu0 %v1777_v15  ;;  %1459 = vmatprep.subr.bf16.mxu1 %v1652_v1 }
 0x468   :  { %831 = vmatpush1.bf16.msra.mxu0 %v1789_v17  ;;  %1460 = vmatpush3.bf16.msra.mxu1 %v1839_v27 }
 0x469   :  { %832 = vmatprep.subr.bf16.mxu0 %v1803_v19  ;;  %1461 = vmatprep.subr.bf16.mxu1 %v1652_v1 }
 0x46c   :  { %833 = vmatpush1.bf16.msra.mxu0 %v1812_v22  ;;  %1462 = vmatpush3.bf16.msra.mxu1 %v1850_v29 }
 0x46d   :  { %834 = vmatprep.subr.bf16.mxu0 %v1825_v24  ;;  %1463 = vmatprep.subr.bf16.mxu1 %v1652_v1 }
 0x470   :  { %835 = vmatpush1.bf16.msra.mxu0 %v1833_v26  ;;  %1464 = vmatpush3.bf16.msra.mxu1 %v1858_v31 }
 0x471   :  { %943 = vmatprep.subr.bf16.mxu0 %v1694_v0  ;;  %1469 = vmatprep.subr.bf16.mxu1 %v1652_v1 }
 0x526   :  { %v731_v25 = vpop.f32.mrb[16].mxu0  ;;  %v772_v50 = vpop.f32.mrb[16].mxu1 }
 0x527   :  { %v778_v28 = vadd.f32 %v731_v25, %v693_v21  ;;  %v733_v20 = vpop.f32.mrb[17].mxu0  ;;  %v1447_v30 = vpop.f32.mrb[17].mxu1  ;;  %v792_v44 = vadd.f32 %v1904_v49, %v772_v50 }
 0x528   :  { %v735_v32 = vpop.f32.mrb[18].mxu0  ;;  %v775_v33 = vpop.f32.mrb[18].mxu1  ;;  %v785_v0 = vadd.f32 %v733_v20, %v694_v37  ;;  %v1632_v37 = vld [vmem:[%s2268_s2] ss:$12 sps:$4 sm:$0xff]  }
 0x529   :  { %v1257_v34 = vmul.f32 -1.442695, %v778_v28  ;;  %v736_v35 = vpop.f32.mrb[19].mxu0  ;;  %v1448_v36 = vpop.f32.mrb[19].mxu1 }
 0x52a   :  { %v1258_v38 = vmul.f32 -1.442695, %v785_v0  ;;  %v932_v33 = vpop.permute.xlu1 %931  ;;  %v1633_v0 = vld [vmem:[%s2268_s2 + $0x8] ss:$12 sps:$4 sm:$0xff]  }
 0x52b   :  { %1587 = vpow2.f32 %v1257_v34 }
 0x52c   :  { %1589 = vpow2.f32 %v1258_v38  ;;  %v1634_v38 = vld [vmem:[%s2268_s2 + $0x1c] ss:$12 sps:$4 sm:$0xff]  }
 0x535   :  { %v1588_v39 = vpop.eup %1587 }
 0x536   :  { %v782_v40 = vadd.f32 1.0, %v1588_v39  ;;  %v1590_v42 = vpop.eup %1589  ;;  %v1635_v39 = vld [vmem:[%s2268_s2 + $0x18] ss:$12 sps:$4 sm:$0xff]  }
 0x537   :  { %v789_v48 = vadd.f32 1.0, %v1590_v42  ;;  %v1639_v42 = vld [vmem:[%s2268_s2 + $0x38] ss:$12 sps:$4 sm:$0xff]  }
 0x538   :  { %1591 = vrcp.f32 %v782_v40  ;;  %v1636_v40 = vld [vmem:[%s2268_s2 + $0x20] ss:$12 sps:$4 sm:$0xff]  }
 0x542   :  { %v1592_v16 = vpop.eup %1591 }
 0x543   :  { %v793_v45 = vmul.f32 %v1592_v16, %v792_v44  ;;  %v1641_v44 = vld [vmem:[%s2268_s2 + $0x48] ss:$12 sps:$4 sm:$0xff]   ;;  %v1642_v16 = vld [vmem:[%s2268_s2 + $0x50] ss:$12 sps:$4 sm:$0xff]  }
 0x545   :  { %v794_v47 = vadd.f32 %v793_v45, %v695_v43  ;;  %v1640_v43 = vld [vmem:[%s2268_s2 + $0x4c] ss:$12 sps:$4 sm:$0xff]   ;;  %v1643_v45 = vld [vmem:[%s2268_s2 + $0x64] ss:$12 sps:$4 sm:$0xff]  }
 0x547   :  { %1593 = vtanh.f32 %v794_v47  ;;  %v1644_v47 = vld [vmem:[%s2268_s2 + $0x60] ss:$12 sps:$4 sm:$0xff]  }
 0x548   :  { %1595 = vrcp.f32 %v789_v48  ;;  %v1645_v48 = vld [vmem:[%s2268_s2 + $0x68] ss:$12 sps:$4 sm:$0xff]  }
 0x551   :  { %v1594_v51 = vpop.eup %1593 }
 0x552   :  { %v796_v52 = vsub.f32 %v2067_v46, %v1594_v51  ;;  %v1596_v53 = vpop.eup %1595 }
 0x554   :  { %v797_v54 = vmul.f32 %v1596_v53, %v796_v52  ;;  %v1647_v52 = vld [vmem:[%s2268_s2 + $0x78] ss:$12 sps:$4 sm:$0xff]   ;;  %v1648_v53 = vld [vmem:[%s2268_s2 + $0x94] ss:$12 sps:$4 sm:$0xff]  }
 0x556   :  { %v798_v55 = vadd.f32 %v1594_v51, %v797_v54  ;;  %v1646_v51 = vld [vmem:[%s2268_s2 + $0x7c] ss:$12 sps:$4 sm:$0xff]  }
 0x557   :  { %v1649_v54 = vld [vmem:[%s2268_s2 + $0x90] ss:$12 sps:$4 sm:$0xff]  }
 0x558   :  { %v805_v56 = vsub.f32 %v798_v55, %v2067_v46  ;;  %v1650_v55 = vld [vmem:[%s2268_s2 + $0xac] ss:$12 sps:$4 sm:$0xff]  }
 0x55a   :  { %v811_v58 = vmul.f32 %v809_v57, %v805_v56  ;;  %v1265_v56 = vld [vmem:[%s2270_s0 + $0x48] sm:$0xff] }
 0x55b   :  { %v939_v57 = vunpack.c.l.bf16 %v1265_v56 }
 0x55c   :  { %v2119_v59 = vadd.f32 %v811_v58, %v2067_v46 }
 0x55e   :  { %v819_v60 = vpack.c.bf16 %v2119_v59, %v2119_v59 }
 0x560   :  { %853 = vmatmul.mubr.bf16.vlgmr.msra.gmra.mrb[20].mxu0 %v819_v60  ;;  %1466 = vmatmul.mubr.bf16.vlgmr.msra.gmra.mrb[20].mxu1 %v819_v60 }
 0x561   :  { %944 = vmatpush1.bf16.msra.mxu0 %v1701_v3  ;;  %1470 = vmatpush3.bf16.msra.mxu1 %v1740_v9  ;;  %v1631_v3 = vld [vmem:[%s2268_s2 + $0x4] ss:$12 sps:$4 sm:$0xff]  }
 0x562   :  { %945 = vmatprep.subr.bf16.mxu0 %v1710_v4  ;;  %1471 = vmatprep.subr.bf16.mxu1 %v1652_v1  ;;  %v1260_v4 = vld [vmem:[%s2270_s0 + $0x3c] sm:$0xff] }
 0x563   :  { %975 = vmatprep.mubr.bf16.mxu0 %v1653_v2  ;;  %1485 = vmatprep.mubr.msk.bf16.mxu1 %vm1654_vm0, %v1652_v1 }
 0x565   :  { %946 = vmatpush1.bf16.msra.mxu0 %v1717_v5  ;;  %1472 = vmatpush3.bf16.msra.mxu1 %v1759_v12  ;;  %v816_v5 = vunpack.c.l.bf16 %v1260_v4 }
 0x566   :  { %947 = vmatprep.subr.bf16.mxu0 %v1723_v6  ;;  %1473 = vmatprep.subr.bf16.mxu1 %v1652_v1 }
 0x569   :  { %948 = vmatpush1.bf16.msra.mxu0 %v1729_v7  ;;  %1474 = vmatpush3.bf16.msra.mxu1 %v1771_v14 }
 0x56a   :  { %949 = vmatprep.subr.bf16.mxu0 %v1735_v8  ;;  %1475 = vmatprep.subr.bf16.mxu1 %v1652_v1 }
 0x56d   :  { %950 = vmatpush1.bf16.msra.mxu0 %v1746_v10  ;;  %1476 = vmatpush3.bf16.msra.mxu1 %v1795_v18 }
 0x56e   :  { %951 = vmatprep.subr.bf16.mxu0 %v1753_v11  ;;  %1477 = vmatprep.subr.bf16.mxu1 %v1652_v1 }
 0x571   :  { %952 = vmatpush1.bf16.msra.mxu0 %v1764_v13  ;;  %1478 = vmatpush3.bf16.msra.mxu1 %v1818_v23 }
 0x572   :  { %953 = vmatprep.subr.bf16.mxu0 %v1777_v15  ;;  %1479 = vmatprep.subr.bf16.mxu1 %v1652_v1 }
 0x575   :  { %954 = vmatpush1.bf16.msra.mxu0 %v1789_v17  ;;  %1480 = vmatpush3.bf16.msra.mxu1 %v1839_v27  ;;  %v817_v17 = vunpack.c.h.bf16 %v1260_v4 }
 0x576   :  { %955 = vmatprep.subr.bf16.mxu0 %v1803_v19  ;;  %1481 = vmatprep.subr.bf16.mxu1 %v1652_v1 }
 0x579   :  { %956 = vmatpush1.bf16.msra.mxu0 %v1812_v22  ;;  %1482 = vmatpush3.bf16.msra.mxu1 %v1850_v29 }
 0x57a   :  { %957 = vmatprep.subr.bf16.mxu0 %v1825_v24  ;;  %1483 = vmatprep.subr.bf16.mxu1 %v1652_v1 }
 0x57d   :  { %958 = vmatpush1.bf16.msra.mxu0 %v1833_v26  ;;  %1484 = vmatpush3.bf16.msra.mxu1 %v1858_v31  ;;  %v818_v26 = vunpack.c.h.bf16 %v2112_v41  ;;  %v1637_v41 = vld [vmem:[%s2268_s2 + $0x34] ss:$12 sps:$4 sm:$0xff]  }
 0x57e   :  { %1066 = vmatprep.subr.bf16.mxu0 %v1631_v3  ;;  %1489 = vmatprep.subr.bf16.mxu1 %v1652_v1 }
 0x633   :  { %v854_v6 = vpop.f32.mrb[20].mxu0  ;;  %v895_v7 = vpop.f32.mrb[20].mxu1 }
 0x634   :  { %v901_v8 = vadd.f32 %v854_v6, %v816_v5  ;;  %v856_v9 = vpop.f32.mrb[21].mxu0  ;;  %v1467_v10 = vpop.f32.mrb[21].mxu1  ;;  %v915_v61 = vadd.f32 %v1904_v49, %v895_v7 }
 0x635   :  { %v858_v11 = vpop.f32.mrb[22].mxu0  ;;  %v898_v12 = vpop.f32.mrb[22].mxu1  ;;  %v908_v18 = vadd.f32 %v856_v9, %v817_v17 }
 0x636   :  { %v1262_v13 = vmul.f32 -1.442695, %v901_v8  ;;  %v859_v14 = vpop.f32.mrb[23].mxu0  ;;  %v1468_v15 = vpop.f32.mrb[23].mxu1  ;;  %v940_v8 = vunpack.c.h.bf16 %v1265_v56  ;;  %v1266_v12 = vld [vmem:[%s2270_s0 + $0x50] ss:$12 sps:$4 sm:$0xff]  }
 0x637   :  { %v1263_v19 = vmul.f32 -1.442695, %v908_v18  ;;  %v941_v14 = vunpack.c.l.bf16 %v1266_v12 }
 0x638   :  { %1597 = vpow2.f32 %v1262_v13 }
 0x639   :  { %1599 = vpow2.f32 %v1263_v19 }
 0x642   :  { %v1598_v22 = vpop.eup %1597 }
 0x643   :  { %v905_v23 = vadd.f32 1.0, %v1598_v22  ;;  %v1600_v24 = vpop.eup %1599 }
 0x644   :  { %v912_v21 = vadd.f32 1.0, %v1600_v24 }
 0x645   :  { %1601 = vrcp.f32 %v905_v23 }
 0x64f   :  { %v1602_v46 = vpop.eup %1601 }
 0x650   :  { %v916_v62 = vmul.f32 %v1602_v46, %v915_v61 }
 0x652   :  { %v917_v63 = vadd.f32 %v916_v62, %v818_v26 }
 0x654   :  { %1603 = vtanh.f32 %v917_v63  ;;  %v1055_v63 = vpop.permute.xlu0 %1054 }
 0x655   :  { %1605 = vrcp.f32 %v912_v21 }
 0x65e   :  { %v1604_v25 = vpop.eup %1603 }
 0x65f   :  { %v919_v50 = vsub.f32 %v2119_v59, %v1604_v25  ;;  %v1606_v28 = vpop.eup %1605 }
 0x661   :  { %v920_v20 = vmul.f32 %v1606_v28, %v919_v50  ;;  %v1270_v28 = vld [vmem:[%s2270_s0 + $0x54] sm:$0xff] }
 0x663   :  { %v921_v30 = vadd.f32 %v1604_v25, %v920_v20  ;;  %v1062_v20 = vunpack.c.l.bf16 %v1270_v28 }
 0x665   :  { %v928_v32 = vsub.f32 %v921_v30, %v2119_v59 }
 0x667   :  { %v934_v34 = vmul.f32 %v932_v33, %v928_v32 }
 0x669   :  { %v2168_v35 = vadd.f32 %v934_v34, %v2119_v59 }
 0x66b   :  { %v942_v36 = vpack.c.bf16 %v2168_v35, %v2168_v35 }
 0x66d   :  { %976 = vmatmul.mubr.bf16.vlgmr.msra.gmra.mrb[24].mxu0 %v942_v36  ;;  %1486 = vmatmul.mubr.bf16.vlgmr.msra.gmra.mrb[24].mxu1 %v942_v36 }
 0x66e   :  { %1067 = vmatpush1.bf16.msra.mxu0 %v1632_v37  ;;  %1490 = vmatpush3.bf16.msra.mxu1 %v1633_v0 }
 0x66f   :  { %1068 = vmatprep.subr.bf16.mxu0 %v1634_v38  ;;  %1491 = vmatprep.subr.bf16.mxu1 %v1652_v1 }
 0x670   :  { %1098 = vmatprep.mubr.bf16.mxu0 %v1653_v2  ;;  %1505 = vmatprep.mubr.msk.bf16.mxu1 %vm1654_vm0, %v1652_v1  ;;  %v1638_v2 = vld [vmem:[%s2268_s2 + $0x30] ss:$12 sps:$4 sm:$0xff]  }
 0x672   :  { %1069 = vmatpush1.bf16.msra.mxu0 %v1635_v39  ;;  %1492 = vmatpush3.bf16.msra.mxu1 %v1636_v40 }
 0x673   :  { %1070 = vmatprep.subr.bf16.mxu0 %v1637_v41  ;;  %1493 = vmatprep.subr.bf16.mxu1 %v1652_v1 }
 0x676   :  { %1071 = vmatpush1.bf16.msra.mxu0 %v1638_v2  ;;  %1494 = vmatpush3.bf16.msra.mxu1 %v1639_v42 }
 0x677   :  { %1072 = vmatprep.subr.bf16.mxu0 %v1640_v43  ;;  %1495 = vmatprep.subr.bf16.mxu1 %v1652_v1 }
 0x67a   :  { %1073 = vmatpush1.bf16.msra.mxu0 %v1641_v44  ;;  %1496 = vmatpush3.bf16.msra.mxu1 %v1642_v16  ;;  %v1064_v16 = vunpack.c.h.bf16 %v1266_v12 }
 0x67b   :  { %1074 = vmatprep.subr.bf16.mxu0 %v1643_v45  ;;  %1497 = vmatprep.subr.bf16.mxu1 %v1652_v1 }
 0x67e   :  { %1075 = vmatpush1.bf16.msra.mxu0 %v1644_v47  ;;  %1498 = vmatpush3.bf16.msra.mxu1 %v1645_v48 }
 0x67f   :  { %1076 = vmatprep.subr.bf16.mxu0 %v1646_v51  ;;  %1499 = vmatprep.subr.bf16.mxu1 %v1652_v1 }
 0x682   :  { %1077 = vmatpush1.bf16.msra.mxu0 %v1647_v52  ;;  %1500 = vmatpush3.bf16.msra.mxu1 %v1839_v27  ;;  %v1651_v27 = vld [vmem:[%s2268_s2 + $0xa8] ss:$12 sps:$4 sm:$0xff]  }
 0x683   :  { %1078 = vmatprep.subr.bf16.mxu0 %v1648_v53  ;;  %1501 = vmatprep.subr.bf16.mxu1 %v1652_v1 }
 0x686   :  { %1079 = vmatpush1.bf16.msra.mxu0 %v1649_v54  ;;  %1502 = vmatpush3.bf16.msra.mxu1 %v1850_v29 }
 0x687   :  { %1080 = vmatprep.subr.bf16.mxu0 %v1650_v55  ;;  %1503 = vmatprep.subr.bf16.mxu1 %v1652_v1 }
 0x68a   :  { %1081 = vmatpush1.bf16.msra.mxu0 %v1651_v27  ;;  %1504 = vmatpush3.bf16.msra.mxu1 %v1858_v31 }
 0x740   :  { %v977_v29 = vpop.f32.mrb[24].mxu0  ;;  %v1018_v58 = vpop.f32.mrb[24].mxu1 }
 0x741   :  { %v1024_v59 = vadd.f32 %v977_v29, %v939_v57  ;;  %v979_v60 = vpop.f32.mrb[25].mxu0  ;;  %v1487_v3 = vpop.f32.mrb[25].mxu1  ;;  %v1038_v15 = vadd.f32 %v1904_v49, %v1018_v58 }
 0x742   :  { %v981_v4 = vpop.f32.mrb[26].mxu0  ;;  %v1021_v5 = vpop.f32.mrb[26].mxu1  ;;  %v1031_v9 = vadd.f32 %v979_v60, %v940_v8  ;;  %v1198_v3 = vstv %s2273_s5 }
 0x743   :  { %v1267_v1 = vmul.f32 -1.442695, %v1024_v59  ;;  %v982_v6 = vpop.f32.mrb[27].mxu0  ;;  %v1488_v7 = vpop.f32.mrb[27].mxu1  ;;  %v1275_v59 = vld [vmem:[%s2272_s4] ss:$0 sm:$0xff] }
 0x744   :  { %v1268_v10 = vmul.f32 -1.442695, %v1031_v9  ;;  %v1178_v29 = vpop.permute.xlu1 %1177 }
 0x745   :  { %1607 = vpow2.f32 %v1267_v1 }
 0x746   :  { %1609 = vpow2.f32 %v1268_v10 }
 0x74f   :  { %v1608_v31 = vpop.eup %1607 }
 0x750   :  { %v1028_v11 = vadd.f32 1.0, %v1608_v31  ;;  %v1610_v13 = vpop.eup %1609 }
 0x751   :  { %v1035_v22 = vadd.f32 1.0, %v1610_v13 }
 0x752   :  { %1611 = vrcp.f32 %v1028_v11 }
 0x75c   :  { %v1612_v17 = vpop.eup %1611 }
 0x75d   :  { %v1039_v18 = vmul.f32 %v1612_v17, %v1038_v15 }
 0x75f   :  { %v1040_v19 = vadd.f32 %v1039_v18, %v941_v14 }
 0x761   :  { %1613 = vtanh.f32 %v1040_v19 }
 0x762   :  { %1615 = vrcp.f32 %v1035_v22 }
 0x76b   :  { %v1614_v23 = vpop.eup %1613 }
 0x76c   :  { %v1042_v24 = vsub.f32 %v2168_v35, %v1614_v23  ;;  %v1616_v26 = vpop.eup %1615 }
 0x76e   :  { %v1043_v61 = vmul.f32 %v1616_v26, %v1042_v24 }
 0x770   :  { %v1044_v46 = vadd.f32 %v1614_v23, %v1043_v61 }
 0x772   :  { %v1051_v62 = vsub.f32 %v1044_v46, %v2168_v35 }
 0x774   :  { %v1057_v21 = vmul.f32 %v1055_v63, %v1051_v62 }
 0x776   :  { %v1058_v25 = vadd.f32 %v1057_v21, %v2168_v35  ;;  %v1063_v35 = vunpack.c.h.bf16 %v1270_v28 }
 0x778   :  { %v1065_v50 = vpack.c.bf16 %v1058_v25, %v1058_v25 }
 0x77a   :  { %1099 = vmatmul.mubr.bf16.vlgmr.msra.gmra.mrb[28].mxu0 %v1065_v50  ;;  %1506 = vmatmul.mubr.bf16.vlgmr.msra.gmra.mrb[28].mxu1 %v1065_v50 }
 0x84d   :  { %v1100_v30 = vpop.f32.mrb[28].mxu0  ;;  %v1141_v32 = vpop.f32.mrb[28].mxu1 }
 0x84e   :  { %v1147_v33 = vadd.f32 %v1100_v30, %v1062_v20  ;;  %v1102_v34 = vpop.f32.mrb[29].mxu0  ;;  %v1507_v36 = vpop.f32.mrb[29].mxu1  ;;  %v1161_v45 = vadd.f32 %v1904_v49, %v1141_v32 }
 0x84f   :  { %v1104_v37 = vpop.f32.mrb[30].mxu0  ;;  %v1144_v0 = vpop.f32.mrb[30].mxu1  ;;  %v1154_v41 = vadd.f32 %v1102_v34, %v1063_v35 }
 0x850   :  { %v1272_v38 = vmul.f32 -1.442695, %v1147_v33  ;;  %v1105_v39 = vpop.f32.mrb[31].mxu0  ;;  %v1508_v40 = vpop.f32.mrb[31].mxu1 }
 0x851   :  { %v1273_v2 = vmul.f32 -1.442695, %v1154_v41 }
 0x852   :  { %1617 = vpow2.f32 %v1272_v38 }
 0x853   :  { %1619 = vpow2.f32 %v1273_v2 }
 0x85c   :  { %v1618_v42 = vpop.eup %1617 }
 0x85d   :  { %v1151_v43 = vadd.f32 1.0, %v1618_v42  ;;  %v1620_v44 = vpop.eup %1619 }
 0x85e   :  { %v1158_v52 = vadd.f32 1.0, %v1620_v44 }
 0x85f   :  { %1621 = vrcp.f32 %v1151_v43 }
 0x869   :  { %v1622_v47 = vpop.eup %1621 }
 0x86a   :  { %v1162_v48 = vmul.f32 %v1622_v47, %v1161_v45 }
 0x86c   :  { %v1163_v51 = vadd.f32 %v1162_v48, %v1064_v16 }
 0x86e   :  { %1623 = vtanh.f32 %v1163_v51 }
 0x86f   :  { %1625 = vrcp.f32 %v1158_v52 }
 0x878   :  { %v1624_v53 = vpop.eup %1623 }
 0x879   :  { %v1165_v54 = vsub.f32 %v1058_v25, %v1624_v53  ;;  %v1626_v55 = vpop.eup %1625 }
 0x87b   :  { %v1166_v27 = vmul.f32 %v1626_v55, %v1165_v54 }
 0x87d   :  { %v1167_v56 = vadd.f32 %v1624_v53, %v1166_v27 }
 0x87f   :  { %v1174_v57 = vsub.f32 %v1167_v56, %v1058_v25 }
 0x881   :  { %v1180_v58 = vmul.f32 %v1178_v29, %v1174_v57 }
 0x883   :  { %v1181_v60 = vadd.f32 %v1180_v58, %v1058_v25 }
 0x885   :  { %v1194_v49 = vmul.f32 %v1275_v59, %v1181_v60 }
 0x887   :  { %1195 = vadd.xlane.f32.xlu0 %v1194_v49 }
 0x914   :  { %v1196_v4 = vpop.xlane.xlu0 %1195 }
 0x915   :  { %v1199_v5 = vadd.f32 %v1198_v3, %v1196_v4 }
 0x917   :  { %v1276_v1 = vmul.f32 -1.442695, %v1199_v5 }
 0x919   :  { %1627 = vpow2.f32 %v1276_v1 }
 0x923   :  { %v1628_v6 = vpop.eup %1627 }
 0x924   :  { %v1203_v7 = vadd.f32 1.0, %v1628_v6 }
 0x926   :  { %1629 = vrcp.f32 %v1203_v7 }
 0x930   :  { %v1630_v8 = vpop.eup %1629 }
 0x931   :  { %1207 = vst.msk [vmem:[%s2274_s6] sm:$0xff] %vm1206_vm9, %v1630_v8 }

</bundles_post_ra>
